<compile_context>
chip_gen: v6e
topology: v6e:2x2x1
jax: 0.10.0
libtpu: 0.0.40
codegen_flags: <defaults>
</compile_context>

<pallas_src>
import random

import numpy as np

import jax
import jax.numpy as jnp
from jax import lax
from jax.experimental import pallas as pl
from jax.experimental.pallas import tpu as pltpu


def _make_kernel(K, C, H, W, Wp, col_shift):
    """Builds the kernel body.

    K:  batch samples per grid step.
    Wp: lane width of the zero-bordered scratch (>= 2W, multiple of 128 so the
        dynamic lane rotate operates on whole vregs).
    col_shift: how the dynamic column offset is applied
        "slice"  : direct dynamic window load  pad[:, ds(sr,H), ds(sc,W)]
        "roll"   : dynamic lane rotate (XLU) + static slice
        "matmul" : 0/1 column-selection matmul (compatibility fallback only)
    """
    r0, c0 = H // 2, W // 2

    def window(pad_ref, sr, sc):
        # Translated image: out[:, i, j] = pad[:, sr + i, sc + j]  (C, H, W).
        if col_shift == "slice":
            return pad_ref[:, pl.ds(sr, H), pl.ds(sc, W)]
        rows = pad_ref[:, pl.ds(sr, H), :]                      # (C, H, Wp)
        if col_shift == "roll":
            # out[..., j] = rows[..., (j + sc) mod Wp]; since sc + W - 1 < Wp
            # the wrap never touches real data and the zero border of the
            # scratch supplies the zero padding of the translate.
            return pltpu.roll(rows, Wp - sc, axis=2)[:, :, :W]
        # "matmul" fallback: ct[q, j] = 1 iff q == j + sc.
        q = lax.broadcasted_iota(jnp.int32, (Wp, W), 0)
        j = lax.broadcasted_iota(jnp.int32, (Wp, W), 1)
        ct = (q == j + sc).astype(jnp.float32)
        flat = jnp.dot(rows.reshape(C * H, Wp), ct,
                       preferred_element_type=jnp.float32)
        return flat.reshape(C, H, W)

    def kernel(starts_ref, bkg_ref, bkgm_ref, d_ref, dm_ref,
               img_ref, mask_ref, pad_d, pad_m):
        g = pl.program_id(0)
        # Fresh zero border every step: no cross-step scratch state, so the
        # batch grid axis can safely be split across TensorCores.
        pad_d[...] = jnp.zeros_like(pad_d)
        pad_m[...] = jnp.zeros_like(pad_m)

        for k in range(K):                                      # small, static
            b = g * K + k
            sr = starts_ref[b, 0]                               # row start
            sc = starts_ref[b, 1]                               # col start

            # Drop the (unpadded) defect sample into the centre of the border.
            pad_d[:, r0:r0 + H, c0:c0 + W] = d_ref[k].astype(jnp.float32)
            pad_m[:, r0:r0 + H, c0:c0 + W] = dm_ref[k].astype(jnp.float32)

            d_new = window(pad_d, sr, sc)
            m_new = window(pad_m, sr, sc)

            bkg = bkg_ref[k].astype(jnp.float32)
            bm = bkgm_ref[k].astype(jnp.float32)
            img_ref[k] = (bkg * (1.0 - m_new) + d_new * m_new
                          ).astype(img_ref.dtype)
            mask_ref[k] = jnp.clip(m_new + bm, 0.0, 1.0).astype(mask_ref.dtype)

    return kernel


def sub_policy_stage_pallas(bkg, bkg_mask, defect, defect_mask, starts, *,
                            samples_per_step=1, col_shift="slice"):
    """Jittable Pallas forward pass.

    starts: int32 [B, 2] window starts (sr, sc) into the virtually 2x-padded
            defect, i.e. translated[i, j] = defect[i + sr - H/2, j + sc - W/2].
    """
    B, C, H, W = bkg.shape
    if H % 2 or W % 2:
        raise ValueError("integer-pixel translation assumes even H and W")
    K = int(samples_per_step)
    if B % K:
        raise ValueError("samples_per_step must divide the batch size")
    Wp = max(128, ((2 * W + 127) // 128) * 128)

    io_spec = pl.BlockSpec((K, C, H, W), lambda g, sref: (g, 0, 0, 0))
    kernel = _make_kernel(K, C, H, W, Wp, col_shift)

    return pl.pallas_call(
        kernel,
        out_shape=(jax.ShapeDtypeStruct((B, C, H, W), bkg.dtype),
                   jax.ShapeDtypeStruct((B, C, H, W), bkg.dtype)),
        grid_spec=pltpu.PrefetchScalarGridSpec(
            num_scalar_prefetch=1,
            grid=(B // K,),
            in_specs=[io_spec, io_spec, io_spec, io_spec],
            out_specs=[io_spec, io_spec],
            scratch_shapes=[pltpu.VMEM((C, 2 * H, Wp), jnp.float32),
                            pltpu.VMEM((C, 2 * H, Wp), jnp.float32)]),
        compiler_params=pltpu.CompilerParams(
            dimension_semantics=("parallel",)),
    )(starts, bkg, bkg_mask, defect, defect_mask)


def sample_translation_starts(defect_location_masks, seed=0):
    """Host-side port of the torch per-sample location sampling (random.sample).

    Returns int32 [B, 2]: (sr, sc) = (H - row, W - col) for the sampled target
    pixel (row, col) of defect_location_masks[b, 0].
    """
    loc = np.asarray(defect_location_masks)
    B, _, H, W = loc.shape
    rng = random.Random(seed)
    starts = np.zeros((B, 2), dtype=np.int32)
    for b in range(B):
        locations = np.argwhere(loc[b, 0] >= 1e-5)
        if locations.shape[0] == 0:
            raise ValueError(f"sample {b}: defect_location_masks has no "
                             "admissible target locations (>= 1e-5)")
        idx = rng.sample(range(locations.shape[0]), 1)[0]
        row, col = int(locations[idx, 0]), int(locations[idx, 1])
        starts[b, 0] = H - row
        starts[b, 1] = W - col
    return starts


def sub_policy_stage(bkg, bkg_mask, defect, defect_mask, defect_location_masks,
                     *, seed=0, samples_per_step=1, col_shift="slice"):
    """Mirrors SubPolicyStage.forward (operations treated as identity,
    apply_poisson=False alpha-blend branch).  Sampling stays on the host."""
    starts = jnp.asarray(
        sample_translation_starts(defect_location_masks, seed))
    return sub_policy_stage_pallas(
        bkg, bkg_mask, defect, defect_mask, starts,
        samples_per_step=samples_per_step, col_shift=col_shift)


if __name__ == "__main__":
    B, C, H, W = 2, 4, 16, 16
    key = jax.random.PRNGKey(0)
    k1, k2, k3 = jax.random.split(key, 3)

    bkg = jax.random.uniform(k1, (B, C, H, W), jnp.float32)
    defect = jax.random.uniform(k2, (B, C, H, W), jnp.float32)
    bkg_mask = (jax.random.uniform(k3, (B, C, H, W), jnp.float32) > 0.9
                ).astype(jnp.float32)

    # Soft defect mask (blob centred in the image).
    yy = jnp.arange(H, dtype=jnp.float32)[:, None] - H / 2
    xx = jnp.arange(W, dtype=jnp.float32)[None, :] - W / 2
    blob = jnp.exp(-(yy ** 2 + xx ** 2) / 8.0)
    defect_mask = jnp.broadcast_to(blob, (B, C, H, W)).astype(jnp.float32)

    # Admissible target locations (channel 0 is the one the module samples).
    loc = np.zeros((B, C, H, W), dtype=np.float32)
    loc[:, 0, 4:12, 4:12] = 1.0
    defect_location_masks = jnp.asarray(loc)

    starts_np = sample_translation_starts(defect_location_masks, seed=0)
    starts = jnp.asarray(starts_np)

    # ---- plain numpy reference (same host-sampled translations) ----
    pad = ((0, 0), (0, 0), (H // 2, H // 2), (W // 2, W // 2))

    def ref_translate(x):
        xp = np.pad(np.asarray(x), pad)
        return np.stack([xp[b, :, starts_np[b, 0]:starts_np[b, 0] + H,
                            starts_np[b, 1]:starts_np[b, 1] + W]
                         for b in range(B)])

    d_new = ref_translate(defect)
    m_new = ref_translate(defect_mask)
    img_ref = np.asarray(bkg) * (1.0 - m_new) + d_new * m_new
    mask_ref = np.clip(m_new + np.asarray(bkg_mask), 0.0, 1.0)

    run = jax.jit(sub_policy_stage_pallas,
                  static_argnames=("samples_per_step", "col_shift"))

    # The dynamic column shift has three equivalent in-kernel expressions.
    # Feature-detect: use the first variant that compiles and verifies on this
    # toolchain (preference: direct dynamic window load, dynamic lane rotate,
    # selection matmul as last-resort compatibility fallback).
    last_err = None
    for mode in ("slice", "roll", "matmul"):
        try:
            img1, mask1 = run(bkg, bkg_mask, defect, defect_mask, starts,
                              samples_per_step=1, col_shift=mode)
            img2, mask2 = run(bkg, bkg_mask, defect, defect_mask, starts,
                              samples_per_step=2, col_shift=mode)
            jax.block_until_ready((img1, mask1, img2, mask2))
            for img, msk in ((img1, mask1), (img2, mask2)):
                np.testing.assert_allclose(np.asarray(img), img_ref,
                                           atol=1e-5, rtol=1e-5)
                np.testing.assert_allclose(np.asarray(msk), mask_ref,
                                           atol=1e-5, rtol=1e-5)
            break
        except Exception as e:  # unsupported lowering -> try next variant
            last_err = e
    else:
        raise last_err

    print("KERNEL_OK")
</pallas_src>

<mosaic_0001>
module attributes {stable_mosaic.version = 11 : i64} {
  func.func @kernel(%arg0: i32, %arg1: memref<2x2xi32, #tpu.memory_space<smem>>, %arg2: memref<1x4x16x16xf32, #tpu.memory_space<vmem>>, %arg3: memref<1x4x16x16xf32, #tpu.memory_space<vmem>>, %arg4: memref<1x4x16x16xf32, #tpu.memory_space<vmem>>, %arg5: memref<1x4x16x16xf32, #tpu.memory_space<vmem>>, %arg6: memref<1x4x16x16xf32, #tpu.memory_space<vmem>>, %arg7: memref<1x4x16x16xf32, #tpu.memory_space<vmem>>, %arg8: memref<4x32x128xf32, #tpu.memory_space<vmem>>, %arg9: memref<4x32x128xf32, #tpu.memory_space<vmem>>) attributes {dimension_semantics = [#tpu.dimension_semantics<parallel>], iteration_bounds = array<i64: 2>, scalar_prefetch = 1 : i64, scratch_operands = 2 : i64, tpu.core_type = #tpu.core_type<tc>, window_params = [{transform_indices = @transform_0, window_bounds = array<i64: 1, 4, 16, 16>}, {transform_indices = @transform_1, window_bounds = array<i64: 1, 4, 16, 16>}, {transform_indices = @transform_2, window_bounds = array<i64: 1, 4, 16, 16>}, {transform_indices = @transform_3, window_bounds = array<i64: 1, 4, 16, 16>}, {transform_indices = @transform_4, window_bounds = array<i64: 1, 4, 16, 16>}, {transform_indices = @transform_5, window_bounds = array<i64: 1, 4, 16, 16>}]} {
    %cst = arith.constant 0.000000e+00 : f32
    %0 = vector.broadcast %cst : f32 to vector<4x32x128xf32>
    %c0 = arith.constant 0 : index
    %c0_0 = arith.constant 0 : index
    %c0_1 = arith.constant 0 : index
    %1 = vector.load %arg8[%c0, %c0_0, %c0_1] : memref<4x32x128xf32, #tpu.memory_space<vmem>>, vector<4x32x128xf32>
    tpu.vector_store %arg8[%c0, %c0_0, %c0_1], %0 {strides = array<i32>} : memref<4x32x128xf32, #tpu.memory_space<vmem>>, vector<4x32x128xf32>,
    %cst_2 = arith.constant 0.000000e+00 : f32
    %2 = vector.broadcast %cst_2 : f32 to vector<4x32x128xf32>
    %c0_3 = arith.constant 0 : index
    %c0_4 = arith.constant 0 : index
    %c0_5 = arith.constant 0 : index
    %3 = vector.load %arg9[%c0_3, %c0_4, %c0_5] : memref<4x32x128xf32, #tpu.memory_space<vmem>>, vector<4x32x128xf32>
    tpu.vector_store %arg9[%c0_3, %c0_4, %c0_5], %2 {strides = array<i32>} : memref<4x32x128xf32, #tpu.memory_space<vmem>>, vector<4x32x128xf32>,
    %c1_i32 = arith.constant 1 : i32
    %4 = arith.muli %arg0, %c1_i32 : i32
    %c0_i32 = arith.constant 0 : i32
    %5 = arith.addi %4, %c0_i32 : i32
    %6 = arith.index_cast %5 : i32 to index
    %c0_6 = arith.constant 0 : index
    %7 = memref.load %arg1[%6, %c0_6] : memref<2x2xi32, #tpu.memory_space<smem>>
    %8 = arith.index_cast %5 : i32 to index
    %c1 = arith.constant 1 : index
    %9 = memref.load %arg1[%8, %c1] : memref<2x2xi32, #tpu.memory_space<smem>>
    %c0_7 = arith.constant 0 : index
    %c0_8 = arith.constant 0 : index
    %c0_9 = arith.constant 0 : index
    %c0_10 = arith.constant 0 : index
    %10 = vector.load %arg4[%c0_7, %c0_8, %c0_9, %c0_10] : memref<1x4x16x16xf32, #tpu.memory_space<vmem>>, vector<1x4x16x16xf32>
    %11 = vector.shape_cast %10 : vector<1x4x16x16xf32> to vector<4x16x16xf32>
    %c0_11 = arith.constant 0 : index
    %c8 = arith.constant 8 : index
    %c8_12 = arith.constant 8 : index
    %12 = vector.load %arg8[%c0_11, %c8, %c8_12] : memref<4x32x128xf32, #tpu.memory_space<vmem>>, vector<4x16x16xf32>
    tpu.vector_store %arg8[%c0_11, %c8, %c8_12], %11 {strides = array<i32>} : memref<4x32x128xf32, #tpu.memory_space<vmem>>, vector<4x16x16xf32>,
    %c0_13 = arith.constant 0 : index
    %c0_14 = arith.constant 0 : index
    %c0_15 = arith.constant 0 : index
    %c0_16 = arith.constant 0 : index
    %13 = vector.load %arg5[%c0_13, %c0_14, %c0_15, %c0_16] : memref<1x4x16x16xf32, #tpu.memory_space<vmem>>, vector<1x4x16x16xf32>
    %14 = vector.shape_cast %13 : vector<1x4x16x16xf32> to vector<4x16x16xf32>
    %c0_17 = arith.constant 0 : index
    %c8_18 = arith.constant 8 : index
    %c8_19 = arith.constant 8 : index
    %15 = vector.load %arg9[%c0_17, %c8_18, %c8_19] : memref<4x32x128xf32, #tpu.memory_space<vmem>>, vector<4x16x16xf32>
    tpu.vector_store %arg9[%c0_17, %c8_18, %c8_19], %14 {strides = array<i32>} : memref<4x32x128xf32, #tpu.memory_space<vmem>>, vector<4x16x16xf32>,
    %c0_20 = arith.constant 0 : index
    %16 = arith.index_cast %7 : i32 to index
    %17 = arith.index_cast %9 : i32 to index
    %18 = vector.load %arg8[%c0_20, %16, %17] : memref<4x32x128xf32, #tpu.memory_space<vmem>>, vector<4x16x16xf32>
    %c0_21 = arith.constant 0 : index
    %19 = arith.index_cast %7 : i32 to index
    %20 = arith.index_cast %9 : i32 to index
    %21 = vector.load %arg9[%c0_21, %19, %20] : memref<4x32x128xf32, #tpu.memory_space<vmem>>, vector<4x16x16xf32>
    %c0_22 = arith.constant 0 : index
    %c0_23 = arith.constant 0 : index
    %c0_24 = arith.constant 0 : index
    %c0_25 = arith.constant 0 : index
    %22 = vector.load %arg2[%c0_22, %c0_23, %c0_24, %c0_25] : memref<1x4x16x16xf32, #tpu.memory_space<vmem>>, vector<1x4x16x16xf32>
    %23 = vector.shape_cast %22 : vector<1x4x16x16xf32> to vector<4x16x16xf32>
    %c0_26 = arith.constant 0 : index
    %c0_27 = arith.constant 0 : index
    %c0_28 = arith.constant 0 : index
    %c0_29 = arith.constant 0 : index
    %24 = vector.load %arg3[%c0_26, %c0_27, %c0_28, %c0_29] : memref<1x4x16x16xf32, #tpu.memory_space<vmem>>, vector<1x4x16x16xf32>
    %25 = vector.shape_cast %24 : vector<1x4x16x16xf32> to vector<4x16x16xf32>
    %cst_30 = arith.constant 1.000000e+00 : f32
    %26 = vector.broadcast %cst_30 : f32 to vector<4x16x16xf32>
    %27 = arith.subf %26, %21 : vector<4x16x16xf32>
    %28 = arith.mulf %23, %27 : vector<4x16x16xf32>
    %29 = arith.mulf %18, %21 : vector<4x16x16xf32>
    %30 = arith.addf %28, %29 : vector<4x16x16xf32>
    %c0_31 = arith.constant 0 : index
    %c0_32 = arith.constant 0 : index
    %c0_33 = arith.constant 0 : index
    %c0_34 = arith.constant 0 : index
    %31 = vector.load %arg6[%c0_31, %c0_32, %c0_33, %c0_34] : memref<1x4x16x16xf32, #tpu.memory_space<vmem>>, vector<1x4x16x16xf32>
    %32 = vector.shape_cast %31 : vector<1x4x16x16xf32> to vector<4x16x16xf32>
    %33 = vector.shape_cast %30 : vector<4x16x16xf32> to vector<1x4x16x16xf32>
    tpu.vector_store %arg6[%c0_31, %c0_32, %c0_33, %c0_34], %33 {strides = array<i32>} : memref<1x4x16x16xf32, #tpu.memory_space<vmem>>, vector<1x4x16x16xf32>,
    %34 = arith.addf %21, %25 : vector<4x16x16xf32>
    %cst_35 = arith.constant 0.000000e+00 : f32
    %cst_36 = arith.constant 1.000000e+00 : f32
    %35 = vector.broadcast %cst_35 : f32 to vector<4x16x16xf32>
    %36 = arith.maximumf %35, %34 : vector<4x16x16xf32>
    %37 = vector.broadcast %cst_36 : f32 to vector<4x16x16xf32>
    %38 = arith.minimumf %37, %36 : vector<4x16x16xf32>
    %c0_37 = arith.constant 0 : index
    %c0_38 = arith.constant 0 : index
    %c0_39 = arith.constant 0 : index
    %c0_40 = arith.constant 0 : index
    %39 = vector.load %arg7[%c0_37, %c0_38, %c0_39, %c0_40] : memref<1x4x16x16xf32, #tpu.memory_space<vmem>>, vector<1x4x16x16xf32>
    %40 = vector.shape_cast %39 : vector<1x4x16x16xf32> to vector<4x16x16xf32>
    %41 = vector.shape_cast %38 : vector<4x16x16xf32> to vector<1x4x16x16xf32>
    tpu.vector_store %arg7[%c0_37, %c0_38, %c0_39, %c0_40], %41 {strides = array<i32>} : memref<1x4x16x16xf32, #tpu.memory_space<vmem>>, vector<1x4x16x16xf32>,
    return
  }
  func.func @transform_0(%arg0: i32, %arg1: memref<2x2xi32, #tpu.memory_space<smem>>) -> (i32, i32, i32, i32) {
    %c0_i32 = arith.constant 0 : i32
    %c0_i32_0 = arith.constant 0 : i32
    %c0_i32_1 = arith.constant 0 : i32
    %c0_i32_2 = arith.constant 0 : i32
    return %arg0, %c0_i32, %c0_i32_0, %c0_i32_1 : i32, i32, i32, i32
  }
  func.func @transform_1(%arg0: i32, %arg1: memref<2x2xi32, #tpu.memory_space<smem>>) -> (i32, i32, i32, i32) {
    %c0_i32 = arith.constant 0 : i32
    %c0_i32_0 = arith.constant 0 : i32
    %c0_i32_1 = arith.constant 0 : i32
    %c0_i32_2 = arith.constant 0 : i32
    return %arg0, %c0_i32, %c0_i32_0, %c0_i32_1 : i32, i32, i32, i32
  }
  func.func @transform_2(%arg0: i32, %arg1: memref<2x2xi32, #tpu.memory_space<smem>>) -> (i32, i32, i32, i32) {
    %c0_i32 = arith.constant 0 : i32
    %c0_i32_0 = arith.constant 0 : i32
    %c0_i32_1 = arith.constant 0 : i32
    %c0_i32_2 = arith.constant 0 : i32
    return %arg0, %c0_i32, %c0_i32_0, %c0_i32_1 : i32, i32, i32, i32
  }
  func.func @transform_3(%arg0: i32, %arg1: memref<2x2xi32, #tpu.memory_space<smem>>) -> (i32, i32, i32, i32) {
    %c0_i32 = arith.constant 0 : i32
    %c0_i32_0 = arith.constant 0 : i32
    %c0_i32_1 = arith.constant 0 : i32
    %c0_i32_2 = arith.constant 0 : i32
    return %arg0, %c0_i32, %c0_i32_0, %c0_i32_1 : i32, i32, i32, i32
  }
  func.func @transform_4(%arg0: i32, %arg1: memref<2x2xi32, #tpu.memory_space<smem>>) -> (i32, i32, i32, i32) {
    %c0_i32 = arith.constant 0 : i32
    %c0_i32_0 = arith.constant 0 : i32
    %c0_i32_1 = arith.constant 0 : i32
    %c0_i32_2 = arith.constant 0 : i32
    return %arg0, %c0_i32, %c0_i32_0, %c0_i32_1 : i32, i32, i32, i32
  }
  func.func @transform_5(%arg0: i32, %arg1: memref<2x2xi32, #tpu.memory_space<smem>>) -> (i32, i32, i32, i32) {
    %c0_i32 = arith.constant 0 : i32
    %c0_i32_0 = arith.constant 0 : i32
    %c0_i32_1 = arith.constant 0 : i32
    %c0_i32_2 = arith.constant 0 : i32
    return %arg0, %c0_i32, %c0_i32_0, %c0_i32_1 : i32, i32, i32, i32
  }
}

module attributes {stable_mosaic.version = 11 : i64} {
  func.func @kernel(%arg0: i32, %arg1: memref<2x2xi32, #tpu.memory_space<smem>>, %arg2: memref<1x4x16x16xf32, #tpu.memory_space<vmem>>, %arg3: memref<1x4x16x16xf32, #tpu.memory_space<vmem>>, %arg4: memref<1x4x16x16xf32, #tpu.memory_space<vmem>>, %arg5: memref<1x4x16x16xf32, #tpu.memory_space<vmem>>, %arg6: memref<1x4x16x16xf32, #tpu.memory_space<vmem>>, %arg7: memref<1x4x16x16xf32, #tpu.memory_space<vmem>>, %arg8: memref<4x32x128xf32, #tpu.memory_space<vmem>>, %arg9: memref<4x32x128xf32, #tpu.memory_space<vmem>>) attributes {dimension_semantics = [#tpu.dimension_semantics<parallel>], iteration_bounds = array<i64: 2>, scalar_prefetch = 1 : i64, scratch_operands = 2 : i64, tpu.core_type = #tpu.core_type<tc>, window_params = [{transform_indices = @transform_0, window_bounds = array<i64: 1, 4, 16, 16>}, {transform_indices = @transform_1, window_bounds = array<i64: 1, 4, 16, 16>}, {transform_indices = @transform_2, window_bounds = array<i64: 1, 4, 16, 16>}, {transform_indices = @transform_3, window_bounds = array<i64: 1, 4, 16, 16>}, {transform_indices = @transform_4, window_bounds = array<i64: 1, 4, 16, 16>}, {transform_indices = @transform_5, window_bounds = array<i64: 1, 4, 16, 16>}]} {
    %cst = arith.constant 0.000000e+00 : f32
    %0 = vector.broadcast %cst : f32 to vector<4x32x128xf32>
    %c0 = arith.constant 0 : index
    %c0_0 = arith.constant 0 : index
    %c0_1 = arith.constant 0 : index
    %1 = vector.load %arg8[%c0, %c0_0, %c0_1] : memref<4x32x128xf32, #tpu.memory_space<vmem>>, vector<4x32x128xf32>
    tpu.vector_store %arg8[%c0, %c0_0, %c0_1], %0 {strides = array<i32>} : memref<4x32x128xf32, #tpu.memory_space<vmem>>, vector<4x32x128xf32>,
    %cst_2 = arith.constant 0.000000e+00 : f32
    %2 = vector.broadcast %cst_2 : f32 to vector<4x32x128xf32>
    %c0_3 = arith.constant 0 : index
    %c0_4 = arith.constant 0 : index
    %c0_5 = arith.constant 0 : index
    %3 = vector.load %arg9[%c0_3, %c0_4, %c0_5] : memref<4x32x128xf32, #tpu.memory_space<vmem>>, vector<4x32x128xf32>
    tpu.vector_store %arg9[%c0_3, %c0_4, %c0_5], %2 {strides = array<i32>} : memref<4x32x128xf32, #tpu.memory_space<vmem>>, vector<4x32x128xf32>,
    %c1_i32 = arith.constant 1 : i32
    %4 = arith.muli %arg0, %c1_i32 : i32
    %c0_i32 = arith.constant 0 : i32
    %5 = arith.addi %4, %c0_i32 : i32
    %6 = arith.index_cast %5 : i32 to index
    %c0_6 = arith.constant 0 : index
    %7 = memref.load %arg1[%6, %c0_6] : memref<2x2xi32, #tpu.memory_space<smem>>
    %8 = arith.index_cast %5 : i32 to index
    %c1 = arith.constant 1 : index
    %9 = memref.load %arg1[%8, %c1] : memref<2x2xi32, #tpu.memory_space<smem>>
    %c0_7 = arith.constant 0 : index
    %c0_8 = arith.constant 0 : index
    %c0_9 = arith.constant 0 : index
    %c0_10 = arith.constant 0 : index
    %10 = vector.load %arg4[%c0_7, %c0_8, %c0_9, %c0_10] : memref<1x4x16x16xf32, #tpu.memory_space<vmem>>, vector<1x4x16x16xf32>
    %11 = vector.shape_cast %10 : vector<1x4x16x16xf32> to vector<4x16x16xf32>
    %c0_11 = arith.constant 0 : index
    %c8 = arith.constant 8 : index
    %c8_12 = arith.constant 8 : index
    %12 = vector.load %arg8[%c0_11, %c8, %c8_12] : memref<4x32x128xf32, #tpu.memory_space<vmem>>, vector<4x16x16xf32>
    tpu.vector_store %arg8[%c0_11, %c8, %c8_12], %11 {strides = array<i32>} : memref<4x32x128xf32, #tpu.memory_space<vmem>>, vector<4x16x16xf32>,
    %c0_13 = arith.constant 0 : index
    %c0_14 = arith.constant 0 : index
    %c0_15 = arith.constant 0 : index
    %c0_16 = arith.constant 0 : index
    %13 = vector.load %arg5[%c0_13, %c0_14, %c0_15, %c0_16] : memref<1x4x16x16xf32, #tpu.memory_space<vmem>>, vector<1x4x16x16xf32>
    %14 = vector.shape_cast %13 : vector<1x4x16x16xf32> to vector<4x16x16xf32>
    %c0_17 = arith.constant 0 : index
    %c8_18 = arith.constant 8 : index
    %c8_19 = arith.constant 8 : index
    %15 = vector.load %arg9[%c0_17, %c8_18, %c8_19] : memref<4x32x128xf32, #tpu.memory_space<vmem>>, vector<4x16x16xf32>
    tpu.vector_store %arg9[%c0_17, %c8_18, %c8_19], %14 {strides = array<i32>} : memref<4x32x128xf32, #tpu.memory_space<vmem>>, vector<4x16x16xf32>,
    %c0_20 = arith.constant 0 : index
    %16 = arith.index_cast %7 : i32 to index
    %c0_21 = arith.constant 0 : index
    %17 = vector.load %arg8[%c0_20, %16, %c0_21] : memref<4x32x128xf32, #tpu.memory_space<vmem>>, vector<4x16x128xf32>
    %c128_i32 = arith.constant 128 : i32
    %18 = arith.subi %c128_i32, %9 : i32
    %19 = tpu.dynamic_rotate %17 by %18 dim 2 : vector<4x16x128xf32>, i32 -> vector<4x16x128xf32>
    %20 = vector.extract_strided_slice %19 {offsets = [0, 0, 0], sizes = [4, 16, 16], strides = [1, 1, 1]} : vector<4x16x128xf32> to vector<4x16x16xf32>
    %c0_22 = arith.constant 0 : index
    %21 = arith.index_cast %7 : i32 to index
    %c0_23 = arith.constant 0 : index
    %22 = vector.load %arg9[%c0_22, %21, %c0_23] : memref<4x32x128xf32, #tpu.memory_space<vmem>>, vector<4x16x128xf32>
    %c128_i32_24 = arith.constant 128 : i32
    %23 = arith.subi %c128_i32_24, %9 : i32
    %24 = tpu.dynamic_rotate %22 by %23 dim 2 : vector<4x16x128xf32>, i32 -> vector<4x16x128xf32>
    %25 = vector.extract_strided_slice %24 {offsets = [0, 0, 0], sizes = [4, 16, 16], strides = [1, 1, 1]} : vector<4x16x128xf32> to vector<4x16x16xf32>
    %c0_25 = arith.constant 0 : index
    %c0_26 = arith.constant 0 : index
    %c0_27 = arith.constant 0 : index
    %c0_28 = arith.constant 0 : index
    %26 = vector.load %arg2[%c0_25, %c0_26, %c0_27, %c0_28] : memref<1x4x16x16xf32, #tpu.memory_space<vmem>>, vector<1x4x16x16xf32>
    %27 = vector.shape_cast %26 : vector<1x4x16x16xf32> to vector<4x16x16xf32>
    %c0_29 = arith.constant 0 : index
    %c0_30 = arith.constant 0 : index
    %c0_31 = arith.constant 0 : index
    %c0_32 = arith.constant 0 : index
    %28 = vector.load %arg3[%c0_29, %c0_30, %c0_31, %c0_32] : memref<1x4x16x16xf32, #tpu.memory_space<vmem>>, vector<1x4x16x16xf32>
    %29 = vector.shape_cast %28 : vector<1x4x16x16xf32> to vector<4x16x16xf32>
    %cst_33 = arith.constant 1.000000e+00 : f32
    %30 = vector.broadcast %cst_33 : f32 to vector<4x16x16xf32>
    %31 = arith.subf %30, %25 : vector<4x16x16xf32>
    %32 = arith.mulf %27, %31 : vector<4x16x16xf32>
    %33 = arith.mulf %20, %25 : vector<4x16x16xf32>
    %34 = arith.addf %32, %33 : vector<4x16x16xf32>
    %c0_34 = arith.constant 0 : index
    %c0_35 = arith.constant 0 : index
    %c0_36 = arith.constant 0 : index
    %c0_37 = arith.constant 0 : index
    %35 = vector.load %arg6[%c0_34, %c0_35, %c0_36, %c0_37] : memref<1x4x16x16xf32, #tpu.memory_space<vmem>>, vector<1x4x16x16xf32>
    %36 = vector.shape_cast %35 : vector<1x4x16x16xf32> to vector<4x16x16xf32>
    %37 = vector.shape_cast %34 : vector<4x16x16xf32> to vector<1x4x16x16xf32>
    tpu.vector_store %arg6[%c0_34, %c0_35, %c0_36, %c0_37], %37 {strides = array<i32>} : memref<1x4x16x16xf32, #tpu.memory_space<vmem>>, vector<1x4x16x16xf32>,
    %38 = arith.addf %25, %29 : vector<4x16x16xf32>
    %cst_38 = arith.constant 0.000000e+00 : f32
    %cst_39 = arith.constant 1.000000e+00 : f32
    %39 = vector.broadcast %cst_38 : f32 to vector<4x16x16xf32>
    %40 = arith.maximumf %39, %38 : vector<4x16x16xf32>
    %41 = vector.broadcast %cst_39 : f32 to vector<4x16x16xf32>
    %42 = arith.minimumf %41, %40 : vector<4x16x16xf32>
    %c0_40 = arith.constant 0 : index
    %c0_41 = arith.constant 0 : index
    %c0_42 = arith.constant 0 : index
    %c0_43 = arith.constant 0 : index
    %43 = vector.load %arg7[%c0_40, %c0_41, %c0_42, %c0_43] : memref<1x4x16x16xf32, #tpu.memory_space<vmem>>, vector<1x4x16x16xf32>
    %44 = vector.shape_cast %43 : vector<1x4x16x16xf32> to vector<4x16x16xf32>
    %45 = vector.shape_cast %42 : vector<4x16x16xf32> to vector<1x4x16x16xf32>
    tpu.vector_store %arg7[%c0_40, %c0_41, %c0_42, %c0_43], %45 {strides = array<i32>} : memref<1x4x16x16xf32, #tpu.memory_space<vmem>>, vector<1x4x16x16xf32>,
    return
  }
  func.func @transform_0(%arg0: i32, %arg1: memref<2x2xi32, #tpu.memory_space<smem>>) -> (i32, i32, i32, i32) {
    %c0_i32 = arith.constant 0 : i32
    %c0_i32_0 = arith.constant 0 : i32
    %c0_i32_1 = arith.constant 0 : i32
    %c0_i32_2 = arith.constant 0 : i32
    return %arg0, %c0_i32, %c0_i32_0, %c0_i32_1 : i32, i32, i32, i32
  }
  func.func @transform_1(%arg0: i32, %arg1: memref<2x2xi32, #tpu.memory_space<smem>>) -> (i32, i32, i32, i32) {
    %c0_i32 = arith.constant 0 : i32
    %c0_i32_0 = arith.constant 0 : i32
    %c0_i32_1 = arith.constant 0 : i32
    %c0_i32_2 = arith.constant 0 : i32
    return %arg0, %c0_i32, %c0_i32_0, %c0_i32_1 : i32, i32, i32, i32
  }
  func.func @transform_2(%arg0: i32, %arg1: memref<2x2xi32, #tpu.memory_space<smem>>) -> (i32, i32, i32, i32) {
    %c0_i32 = arith.constant 0 : i32
    %c0_i32_0 = arith.constant 0 : i32
    %c0_i32_1 = arith.constant 0 : i32
    %c0_i32_2 = arith.constant 0 : i32
    return %arg0, %c0_i32, %c0_i32_0, %c0_i32_1 : i32, i32, i32, i32
  }
  func.func @transform_3(%arg0: i32, %arg1: memref<2x2xi32, #tpu.memory_space<smem>>) -> (i32, i32, i32, i32) {
    %c0_i32 = arith.constant 0 : i32
    %c0_i32_0 = arith.constant 0 : i32
    %c0_i32_1 = arith.constant 0 : i32
    %c0_i32_2 = arith.constant 0 : i32
    return %arg0, %c0_i32, %c0_i32_0, %c0_i32_1 : i32, i32, i32, i32
  }
  func.func @transform_4(%arg0: i32, %arg1: memref<2x2xi32, #tpu.memory_space<smem>>) -> (i32, i32, i32, i32) {
    %c0_i32 = arith.constant 0 : i32
    %c0_i32_0 = arith.constant 0 : i32
    %c0_i32_1 = arith.constant 0 : i32
    %c0_i32_2 = arith.constant 0 : i32
    return %arg0, %c0_i32, %c0_i32_0, %c0_i32_1 : i32, i32, i32, i32
  }
  func.func @transform_5(%arg0: i32, %arg1: memref<2x2xi32, #tpu.memory_space<smem>>) -> (i32, i32, i32, i32) {
    %c0_i32 = arith.constant 0 : i32
    %c0_i32_0 = arith.constant 0 : i32
    %c0_i32_1 = arith.constant 0 : i32
    %c0_i32_2 = arith.constant 0 : i32
    return %arg0, %c0_i32, %c0_i32_0, %c0_i32_1 : i32, i32, i32, i32
  }
}

module attributes {stable_mosaic.version = 11 : i64} {
  func.func @kernel(%arg0: i32, %arg1: memref<2x2xi32, #tpu.memory_space<smem>>, %arg2: memref<1x4x16x16xf32, #tpu.memory_space<vmem>>, %arg3: memref<1x4x16x16xf32, #tpu.memory_space<vmem>>, %arg4: memref<1x4x16x16xf32, #tpu.memory_space<vmem>>, %arg5: memref<1x4x16x16xf32, #tpu.memory_space<vmem>>, %arg6: memref<1x4x16x16xf32, #tpu.memory_space<vmem>>, %arg7: memref<1x4x16x16xf32, #tpu.memory_space<vmem>>, %arg8: memref<4x32x128xf32, #tpu.memory_space<vmem>>, %arg9: memref<4x32x128xf32, #tpu.memory_space<vmem>>) attributes {dimension_semantics = [#tpu.dimension_semantics<parallel>], iteration_bounds = array<i64: 2>, scalar_prefetch = 1 : i64, scratch_operands = 2 : i64, tpu.core_type = #tpu.core_type<tc>, window_params = [{transform_indices = @transform_0, window_bounds = array<i64: 1, 4, 16, 16>}, {transform_indices = @transform_1, window_bounds = array<i64: 1, 4, 16, 16>}, {transform_indices = @transform_2, window_bounds = array<i64: 1, 4, 16, 16>}, {transform_indices = @transform_3, window_bounds = array<i64: 1, 4, 16, 16>}, {transform_indices = @transform_4, window_bounds = array<i64: 1, 4, 16, 16>}, {transform_indices = @transform_5, window_bounds = array<i64: 1, 4, 16, 16>}]} {
    %cst = arith.constant 0.000000e+00 : f32
    %0 = vector.broadcast %cst : f32 to vector<4x32x128xf32>
    %c0 = arith.constant 0 : index
    %c0_0 = arith.constant 0 : index
    %c0_1 = arith.constant 0 : index
    %1 = vector.load %arg8[%c0, %c0_0, %c0_1] : memref<4x32x128xf32, #tpu.memory_space<vmem>>, vector<4x32x128xf32>
    tpu.vector_store %arg8[%c0, %c0_0, %c0_1], %0 {strides = array<i32>} : memref<4x32x128xf32, #tpu.memory_space<vmem>>, vector<4x32x128xf32>,
    %cst_2 = arith.constant 0.000000e+00 : f32
    %2 = vector.broadcast %cst_2 : f32 to vector<4x32x128xf32>
    %c0_3 = arith.constant 0 : index
    %c0_4 = arith.constant 0 : index
    %c0_5 = arith.constant 0 : index
    %3 = vector.load %arg9[%c0_3, %c0_4, %c0_5] : memref<4x32x128xf32, #tpu.memory_space<vmem>>, vector<4x32x128xf32>
    tpu.vector_store %arg9[%c0_3, %c0_4, %c0_5], %2 {strides = array<i32>} : memref<4x32x128xf32, #tpu.memory_space<vmem>>, vector<4x32x128xf32>,
    %c1_i32 = arith.constant 1 : i32
    %4 = arith.muli %arg0, %c1_i32 : i32
    %c0_i32 = arith.constant 0 : i32
    %5 = arith.addi %4, %c0_i32 : i32
    %6 = arith.index_cast %5 : i32 to index
    %c0_6 = arith.constant 0 : index
    %7 = memref.load %arg1[%6, %c0_6] : memref<2x2xi32, #tpu.memory_space<smem>>
    %8 = arith.index_cast %5 : i32 to index
    %c1 = arith.constant 1 : index
    %9 = memref.load %arg1[%8, %c1] : memref<2x2xi32, #tpu.memory_space<smem>>
    %c0_7 = arith.constant 0 : index
    %c0_8 = arith.constant 0 : index
    %c0_9 = arith.constant 0 : index
    %c0_10 = arith.constant 0 : index
    %10 = vector.load %arg4[%c0_7, %c0_8, %c0_9, %c0_10] : memref<1x4x16x16xf32, #tpu.memory_space<vmem>>, vector<1x4x16x16xf32>
    %11 = vector.shape_cast %10 : vector<1x4x16x16xf32> to vector<4x16x16xf32>
    %c0_11 = arith.constant 0 : index
    %c8 = arith.constant 8 : index
    %c8_12 = arith.constant 8 : index
    %12 = vector.load %arg8[%c0_11, %c8, %c8_12] : memref<4x32x128xf32, #tpu.memory_space<vmem>>, vector<4x16x16xf32>
    tpu.vector_store %arg8[%c0_11, %c8, %c8_12], %11 {strides = array<i32>} : memref<4x32x128xf32, #tpu.memory_space<vmem>>, vector<4x16x16xf32>,
    %c0_13 = arith.constant 0 : index
    %c0_14 = arith.constant 0 : index
    %c0_15 = arith.constant 0 : index
    %c0_16 = arith.constant 0 : index
    %13 = vector.load %arg5[%c0_13, %c0_14, %c0_15, %c0_16] : memref<1x4x16x16xf32, #tpu.memory_space<vmem>>, vector<1x4x16x16xf32>
    %14 = vector.shape_cast %13 : vector<1x4x16x16xf32> to vector<4x16x16xf32>
    %c0_17 = arith.constant 0 : index
    %c8_18 = arith.constant 8 : index
    %c8_19 = arith.constant 8 : index
    %15 = vector.load %arg9[%c0_17, %c8_18, %c8_19] : memref<4x32x128xf32, #tpu.memory_space<vmem>>, vector<4x16x16xf32>
    tpu.vector_store %arg9[%c0_17, %c8_18, %c8_19], %14 {strides = array<i32>} : memref<4x32x128xf32, #tpu.memory_space<vmem>>, vector<4x16x16xf32>,
    %c0_20 = arith.constant 0 : index
    %16 = arith.index_cast %7 : i32 to index
    %c0_21 = arith.constant 0 : index
    %17 = vector.load %arg8[%c0_20, %16, %c0_21] : memref<4x32x128xf32, #tpu.memory_space<vmem>>, vector<4x16x128xf32>
    %18 = tpu.iota {dimensions = array<i32: 0>} : vector<128x16xi32>
    %19 = tpu.iota {dimensions = array<i32: 1>} : vector<128x16xi32>
    %20 = vector.broadcast %9 : i32 to vector<128x16xi32>
    %21 = arith.addi %19, %20 : vector<128x16xi32>
    %22 = arith.cmpi eq, %18, %21 : vector<128x16xi32>
    %23 = arith.extui %22 : vector<128x16xi1> to vector<128x16xi32>
    %24 = arith.sitofp %23 : vector<128x16xi32> to vector<128x16xf32>
    %25 = vector.shape_cast %17 : vector<4x16x128xf32> to vector<64x128xf32>
    %cst_22 = arith.constant dense<0.000000e+00> : vector<64x16xf32>
    %26 = tpu.matmul %25, %24, %cst_22 {dimension_numbers = #tpu.dot_dimension_numbers<[1], [0], [0], [1], [0, 0, 1, 1], [], []>} : vector<64x128xf32>, vector<128x16xf32>, vector<64x16xf32> -> vector<64x16xf32>
    %27 = vector.shape_cast %26 : vector<64x16xf32> to vector<4x16x16xf32>
    %c0_23 = arith.constant 0 : index
    %28 = arith.index_cast %7 : i32 to index
    %c0_24 = arith.constant 0 : index
    %29 = vector.load %arg9[%c0_23, %28, %c0_24] : memref<4x32x128xf32, #tpu.memory_space<vmem>>, vector<4x16x128xf32>
    %30 = tpu.iota {dimensions = array<i32: 0>} : vector<128x16xi32>
    %31 = tpu.iota {dimensions = array<i32: 1>} : vector<128x16xi32>
    %32 = vector.broadcast %9 : i32 to vector<128x16xi32>
    %33 = arith.addi %31, %32 : vector<128x16xi32>
    %34 = arith.cmpi eq, %30, %33 : vector<128x16xi32>
    %35 = arith.extui %34 : vector<128x16xi1> to vector<128x16xi32>
    %36 = arith.sitofp %35 : vector<128x16xi32> to vector<128x16xf32>
    %37 = vector.shape_cast %29 : vector<4x16x128xf32> to vector<64x128xf32>
    %cst_25 = arith.constant dense<0.000000e+00> : vector<64x16xf32>
    %38 = tpu.matmul %37, %36, %cst_25 {dimension_numbers = #tpu.dot_dimension_numbers<[1], [0], [0], [1], [0, 0, 1, 1], [], []>} : vector<64x128xf32>, vector<128x16xf32>, vector<64x16xf32> -> vector<64x16xf32>
    %39 = vector.shape_cast %38 : vector<64x16xf32> to vector<4x16x16xf32>
    %c0_26 = arith.constant 0 : index
    %c0_27 = arith.constant 0 : index
    %c0_28 = arith.constant 0 : index
    %c0_29 = arith.constant 0 : index
    %40 = vector.load %arg2[%c0_26, %c0_27, %c0_28, %c0_29] : memref<1x4x16x16xf32, #tpu.memory_space<vmem>>, vector<1x4x16x16xf32>
    %41 = vector.shape_cast %40 : vector<1x4x16x16xf32> to vector<4x16x16xf32>
    %c0_30 = arith.constant 0 : index
    %c0_31 = arith.constant 0 : index
    %c0_32 = arith.constant 0 : index
    %c0_33 = arith.constant 0 : index
    %42 = vector.load %arg3[%c0_30, %c0_31, %c0_32, %c0_33] : memref<1x4x16x16xf32, #tpu.memory_space<vmem>>, vector<1x4x16x16xf32>
    %43 = vector.shape_cast %42 : vector<1x4x16x16xf32> to vector<4x16x16xf32>
    %cst_34 = arith.constant 1.000000e+00 : f32
    %44 = vector.broadcast %cst_34 : f32 to vector<4x16x16xf32>
    %45 = arith.subf %44, %39 : vector<4x16x16xf32>
    %46 = arith.mulf %41, %45 : vector<4x16x16xf32>
    %47 = arith.mulf %27, %39 : vector<4x16x16xf32>
    %48 = arith.addf %46, %47 : vector<4x16x16xf32>
    %c0_35 = arith.constant 0 : index
    %c0_36 = arith.constant 0 : index
    %c0_37 = arith.constant 0 : index
    %c0_38 = arith.constant 0 : index
    %49 = vector.load %arg6[%c0_35, %c0_36, %c0_37, %c0_38] : memref<1x4x16x16xf32, #tpu.memory_space<vmem>>, vector<1x4x16x16xf32>
    %50 = vector.shape_cast %49 : vector<1x4x16x16xf32> to vector<4x16x16xf32>
    %51 = vector.shape_cast %48 : vector<4x16x16xf32> to vector<1x4x16x16xf32>
    tpu.vector_store %arg6[%c0_35, %c0_36, %c0_37, %c0_38], %51 {strides = array<i32>} : memref<1x4x16x16xf32, #tpu.memory_space<vmem>>, vector<1x4x16x16xf32>,
    %52 = arith.addf %39, %43 : vector<4x16x16xf32>
    %cst_39 = arith.constant 0.000000e+00 : f32
    %cst_40 = arith.constant 1.000000e+00 : f32
    %53 = vector.broadcast %cst_39 : f32 to vector<4x16x16xf32>
    %54 = arith.maximumf %53, %52 : vector<4x16x16xf32>
    %55 = vector.broadcast %cst_40 : f32 to vector<4x16x16xf32>
    %56 = arith.minimumf %55, %54 : vector<4x16x16xf32>
    %c0_41 = arith.constant 0 : index
    %c0_42 = arith.constant 0 : index
    %c0_43 = arith.constant 0 : index
    %c0_44 = arith.constant 0 : index
    %57 = vector.load %arg7[%c0_41, %c0_42, %c0_43, %c0_44] : memref<1x4x16x16xf32, #tpu.memory_space<vmem>>, vector<1x4x16x16xf32>
    %58 = vector.shape_cast %57 : vector<1x4x16x16xf32> to vector<4x16x16xf32>
    %59 = vector.shape_cast %56 : vector<4x16x16xf32> to vector<1x4x16x16xf32>
    tpu.vector_store %arg7[%c0_41, %c0_42, %c0_43, %c0_44], %59 {strides = array<i32>} : memref<1x4x16x16xf32, #tpu.memory_space<vmem>>, vector<1x4x16x16xf32>,
    return
  }
  func.func @transform_0(%arg0: i32, %arg1: memref<2x2xi32, #tpu.memory_space<smem>>) -> (i32, i32, i32, i32) {
    %c0_i32 = arith.constant 0 : i32
    %c0_i32_0 = arith.constant 0 : i32
    %c0_i32_1 = arith.constant 0 : i32
    %c0_i32_2 = arith.constant 0 : i32
    return %arg0, %c0_i32, %c0_i32_0, %c0_i32_1 : i32, i32, i32, i32
  }
  func.func @transform_1(%arg0: i32, %arg1: memref<2x2xi32, #tpu.memory_space<smem>>) -> (i32, i32, i32, i32) {
    %c0_i32 = arith.constant 0 : i32
    %c0_i32_0 = arith.constant 0 : i32
    %c0_i32_1 = arith.constant 0 : i32
    %c0_i32_2 = arith.constant 0 : i32
    return %arg0, %c0_i32, %c0_i32_0, %c0_i32_1 : i32, i32, i32, i32
  }
  func.func @transform_2(%arg0: i32, %arg1: memref<2x2xi32, #tpu.memory_space<smem>>) -> (i32, i32, i32, i32) {
    %c0_i32 = arith.constant 0 : i32
    %c0_i32_0 = arith.constant 0 : i32
    %c0_i32_1 = arith.constant 0 : i32
    %c0_i32_2 = arith.constant 0 : i32
    return %arg0, %c0_i32, %c0_i32_0, %c0_i32_1 : i32, i32, i32, i32
  }
  func.func @transform_3(%arg0: i32, %arg1: memref<2x2xi32, #tpu.memory_space<smem>>) -> (i32, i32, i32, i32) {
    %c0_i32 = arith.constant 0 : i32
    %c0_i32_0 = arith.constant 0 : i32
    %c0_i32_1 = arith.constant 0 : i32
    %c0_i32_2 = arith.constant 0 : i32
    return %arg0, %c0_i32, %c0_i32_0, %c0_i32_1 : i32, i32, i32, i32
  }
  func.func @transform_4(%arg0: i32, %arg1: memref<2x2xi32, #tpu.memory_space<smem>>) -> (i32, i32, i32, i32) {
    %c0_i32 = arith.constant 0 : i32
    %c0_i32_0 = arith.constant 0 : i32
    %c0_i32_1 = arith.constant 0 : i32
    %c0_i32_2 = arith.constant 0 : i32
    return %arg0, %c0_i32, %c0_i32_0, %c0_i32_1 : i32, i32, i32, i32
  }
  func.func @transform_5(%arg0: i32, %arg1: memref<2x2xi32, #tpu.memory_space<smem>>) -> (i32, i32, i32, i32) {
    %c0_i32 = arith.constant 0 : i32
    %c0_i32_0 = arith.constant 0 : i32
    %c0_i32_1 = arith.constant 0 : i32
    %c0_i32_2 = arith.constant 0 : i32
    return %arg0, %c0_i32, %c0_i32_0, %c0_i32_1 : i32, i32, i32, i32
  }
}

</mosaic_0001>

<bundles_post_ra>
// kernel: sub_policy_stage_pallas.1
= control target key start
LH: loop header
LB: loop body
LE: loop exit
PB: predicated region body
PF: predicated region fallthrough
CT: control target
= control target key end

     0   :  { %s1739_s0 = inlined_call_operand.vmem [shape: s32[2,2], index: 0, kind: input, shape index: {}]   ;;  %s1740_s1 = inlined_call_operand.hbm [shape: f32[2,4,16,16], index: 1, kind: input, shape index: {}]   ;;  %s1741_s2 = inlined_call_operand.hbm [shape: f32[2,4,16,16], index: 2, kind: input, shape index: {}]   ;;  %s1742_s3 = inlined_call_operand.hbm [shape: f32[2,4,16,16], index: 3, kind: input, shape index: {}]   ;;  %s1743_s4 = inlined_call_operand.hbm [shape: f32[2,4,16,16], index: 4, kind: input, shape index: {}]   ;;  %s1744_s5 = inlined_call_operand.hbm [shape: f32[2,4,16,16], index: 5, kind: output, shape index: {0}]   ;;  %s1745_s6 = inlined_call_operand.hbm [shape: f32[2,4,16,16], index: 6, kind: output, shape index: {1}]  }
   0x1   :  { %1756 = sst [smem:[#allocation27_spill]] %s1740_s1  ;;  %s12_s23 = sshll.u32 %s1739_s0, 4  ;;  %s13_s23 = int_to_ptr.vmem [resolvable:$true] %s12_s23 }
   0x2   :  { %1757 = sst [smem:[#allocation28_spill]] %s1741_s2  ;;  %s970_s24 = scalar_lea.vmem %s13_s23, 32 }
   0x3   :  { %p971_p0 = scmp.ne.s32.totalorder %s13_s23, %s970_s24  ;;  %p975_p1 = scmp.lt.s32.totalorder %s13_s23, %s13_s23 }
   0x4   :  { %p976_p2 = scmp.lt.s32.totalorder %s970_s24, %s970_s24 }
   0x6   :  { %p977_p3 = por %p976_p2, %p975_p1 }
   0x8   :  { %p978_p4 = pnand %p977_p3, %p971_p0 }
   0xa   :  { %981 = shalt.err (!%p978_p4)  }
   0xb   :  { %s1200_s25 = smov [#allocation5]  }
   0xc   :  { %15 = dma.vmem_to_smem %s13_s23, 32, %s1200_s25, [#allocation4] }
   0xd   :  { %1162 = dma.done.wait [#allocation4], 32 }
   0xe   :  { %1163 = vsyncadd [#allocation4], 4294967264 }
   0xf   :  { %17 = sfence }
  0x10   :  { %18 = vsyncpa [#allocation7], 0 }
  0x11   :  { %20 = vsyncpa [#allocation7 + $0x1], 0 }
  0x12   :  { %21 = vsyncpa [#allocation10], 0 }
  0x13   :  { %23 = vsyncpa [#allocation10 + $0x1], 0 }
  0x14   :  { %24 = vsyncpa [#allocation13], 0 }
  0x15   :  { %26 = vsyncpa [#allocation13 + $0x1], 0 }
  0x16   :  { %27 = vsyncpa [#allocation8], 0 }
  0x17   :  { %29 = vsyncpa [#allocation8 + $0x1], 0 }
  0x18   :  { %30 = vsyncpa [#allocation16], 0 }
  0x19   :  { %32 = vsyncpa [#allocation16 + $0x1], 0  ;;  %s1250_s0 = smov 0   ;;  %s1252_s26 = smov 0  }
  0x1a   :  { %s1254_s27 = smov 0   ;;  %s1256_s28 = smov 0  }
  0x1b LB: > { %1758 = sst [smem:[#allocation23_spill]] %s1194_s27  ;;  %s1271_s29 = sadd.s32 4294967295, %s1198_s28   ;;  %s1198_s28 = sphi %s1256_s28, %s1779_s28   ;;  %s1194_s27 = sphi %s1254_s27, %s1781_s27   ;;  %s1190_s26 = sphi %s1252_s26, %s1783_s26   ;;  %s1186_s0 = sphi %s1250_s0, %s1782_s0  }
  0x1c   : > { %1759 = sst [smem:[#allocation24_spill]] %s1198_s28  ;;  %s861_s30 = sadd.s32 4294967294, %s1198_s28  }
  0x1d   : > { %s1275_s7 = sadd.s32 1, %s1198_s28   ;;  %s45_s8 = sadd.s32 1, %s1194_s27 }
  0x1e   : > { %1760 = sst [smem:[#allocation25_spill]] %s1275_s7  ;;  %s42_s9 = ssub.s32 %s1198_s28, %s1275_s7 }
  0x1f   : > { %p52_p5 = scmp.ne.s32.totalorder %s1194_s27, %s1190_s26  ;;  %p43_p6 = scmp.eq.s32.totalorder %s42_s9, 0 }
  0x20   : > { %p53_p7 = scmp.eq.s32.totalorder %s1198_s28, 0  ;;  %p58_p8 = scmp.ne.s32.totalorder %s1190_s26, %s1186_s0 }
  0x21   : > { %p59_p9 = scmp.eq.s32.totalorder %s1271_s29, 0  ;;  %p160_p12 = scmp.eq.s32.totalorder %s1271_s29, 1 }
  0x22   : > { %s1287_s10 = scalar_select %p43_p6, %s1194_s27, %s45_s8  }
  0x23   : > { %p54_p10 = por %p53_p7, %p52_p5  ;;  %p1289_p11 = por %p59_p9, %p58_p8 }
  0x24   : > { %1761 = sst [smem:[#allocation26_spill]] %s1287_s10  ;;  %p166_p13 = scmp.eq.s32.totalorder %s861_s30, 1 }
  0x25   : > { %s1762_s11 = scalar_select %p1289_p11, 1, 0 }
  0x26   : > { %p930_p1 = scmp.lt.s32.totalorder %s1198_s28, 2  ;;  %p1296_p2 = por %p160_p12, %p52_p5 }
  0x27   : > { %p1300_p3 = por %p166_p13, %p58_p8  ;;  %s1305_s14 = sand.u32 1, %s1194_s27  }
  0x28   : > { %s1763_s12 = scalar_select %p1296_p2, 1, 0 }
  0x29   : > { %s1764_s13 = scalar_select %p1300_p3, 1, 0 }
  0x2a   : > { %s1308_s15 = sshll.u32 %s1198_s28, 10  ;;  %s1311_s16 = sshll.u32 %s1305_s14, 6 }
  0x2b   : > { %p1313_p4 = pnand %p930_p1, %p54_p10  ;;  %s233_s18 = sand.u32 1, %s1198_s28  }
  0x2c   : > { %s1766_s2 = sld [smem:[#allocation28_spill]]  ;;  %s237_s22 = scalar_lea.vmem [#allocation9], %s1311_s16 }
  0x2d   : > { %s244_s23 = sshll.u32 %s237_s22, 4  ;;  %s1328_s24 = scalar_lea.sflag [#allocation10], %s233_s18  ;;  %s1325_s23 = int_to_ptr.vmem [resolvable:$true] %s244_s23 }
  0x2e   : > { %p1334_p7 = pneg %p1313_p4 }
  0x32   : > { %s1322_s21 = scalar_lea.hbm %s1766_s2, %s1308_s15  ;;  %s987_s19 = scalar_lea.hbm %s1766_s2, 2048 }
  0x33   : > { %s982_s25 = scalar_lea.hbm %s1322_s21, 1024  ;;  %p988_p10 = scmp.lt.s32.totalorder %s1322_s21, %s1766_s2 }
  0x34   : > { %p983_p6 = scmp.ne.s32.totalorder %s1322_s21, %s982_s25  ;;  %p989_p12 = scmp.lt.s32.totalorder %s987_s19, %s982_s25 }
  0x36   : > { %p985_p8 = pnand %p1334_p7, %p983_p6  ;;  %p990_p13 = por %p989_p12, %p988_p10 }
  0x38   : > { %p986_p9 = pneg %p985_p8 }
  0x3a   : > { %p991_p1 = pnand %p990_p13, %p986_p9 }
  0x3c   : > { %994 = shalt.err (!%p991_p1)
}
  0x3d   : > { %s995_s18 = scalar_lea.vmem %s1325_s23, 1024  ;;  %s1201_s10 = smov [#allocation9]  }
  0x3e   : > { %p996_p0 = scmp.ne.s32.totalorder %s1325_s23, %s995_s18  ;;  %s1000_s8 = sshll.u32 %s1201_s10, 4  ;;  %s1001_s8 = int_to_ptr.vmem [resolvable:$false] %s1000_s8 }
  0x3f   : > { %s1002_s9 = scalar_lea.vmem %s1001_s8, 2048  ;;  %p1003_p5 = scmp.lt.s32.totalorder %s1325_s23, %s1001_s8 }
  0x40   : > { %p998_p6 = pnand %p996_p0, %p1334_p7  ;;  %p1004_p3 = scmp.lt.s32.totalorder %s1002_s9, %s995_s18 }
  0x42   : > { %p999_p8 = pneg %p998_p6  ;;  %p1005_p2 = por %p1004_p3, %p1003_p5 }
  0x44   : > { %p1006_p11 = pnand %p1005_p2, %p999_p8 }
  0x46   : > { %1009 = shalt.err (!%p1006_p11)
}
  0x47   : > { %s1748_s25 = smov 128   ;;  %s1750_s19 = smov 8  }
  0x48   : > { %916 = dma.hbm_to_vmem [thread:$0]  (!%p1313_p4), %s1322_s21, 1024, %s1325_s23, %s1328_s24, %s1748_s25, %s1748_s25, %s1750_s19  }
  0x49   : > { %p294_p0 = scmp.lt.s32.totalorder %s1198_s28, 3  ;;  %s1768_s1 = sld [smem:[#allocation27_spill]] }
  0x4a   : > { %p1769_p11 = scmp.ge.s32.totalorder %s1198_s28, 1  ;;  %s216_s8 = scalar_lea.vmem [#allocation6], %s1311_s16 }
  0x4b   : > { %s223_s9 = sshll.u32 %s216_s8, 4  ;;  %s213_s2 = scalar_lea.sflag [#allocation7], %s1305_s14  ;;  %s1374_s9 = int_to_ptr.vmem [resolvable:$true] %s223_s9 }
  0x4c   : > { %p1369_p2 = pnand %p1769_p11, %p294_p0 }
  0x4e   : > { %s1770_s18 = scalar_select %p1369_p2, 1, 0 }
  0x4f   : > { %s1365_s22 = scalar_lea.hbm %s1768_s1, %s1308_s15  ;;  %s1015_s20 = scalar_lea.hbm %s1768_s1, 2048 }
  0x50   : > { %s1010_s21 = scalar_lea.hbm %s1365_s22, 1024  ;;  %p1016_p10 = scmp.lt.s32.totalorder %s1365_s22, %s1768_s1 }
  0x51   : > { %p1011_p3 = scmp.ne.s32.totalorder %s1365_s22, %s1010_s21  ;;  %p1017_p12 = scmp.lt.s32.totalorder %s1015_s20, %s1010_s21 }
  0x53   : > { %p1013_p5 = pnand %p1011_p3, %p1334_p7  ;;  %p1018_p13 = por %p1017_p12, %p1016_p10 }
  0x55   : > { %p1014_p9 = pneg %p1013_p5 }
  0x57   : > { %p1019_p1 = pnand %p1018_p13, %p1014_p9 }
  0x59   : > { %1022 = shalt.err (!%p1019_p1)
}
  0x5a   : > { %s1023_s8 = scalar_lea.vmem %s1374_s9, 1024  ;;  %s1204_s27 = smov [#allocation6]  }
  0x5b   : > { %p1024_p6 = scmp.ne.s32.totalorder %s1374_s9, %s1023_s8  ;;  %s1028_s23 = sshll.u32 %s1204_s27, 4  ;;  %s1029_s23 = int_to_ptr.vmem [resolvable:$false] %s1028_s23 }
  0x5c   : > { %s1030_s10 = scalar_lea.vmem %s1029_s23, 2048  ;;  %p1031_p11 = scmp.lt.s32.totalorder %s1374_s9, %s1029_s23 }
  0x5d   : > { %p1026_p8 = pnand %p1024_p6, %p1334_p7  ;;  %p1032_p3 = scmp.lt.s32.totalorder %s1030_s10, %s1023_s8 }
  0x5f   : > { %p1027_p0 = pneg %p1026_p8  ;;  %p1033_p5 = por %p1032_p3, %p1031_p11 }
  0x61   : > { %p1034_p2 = pnand %p1033_p5, %p1027_p0 }
  0x63   : > { %1037 = shalt.err (!%p1034_p2)
}
  0x64   : > { %s1771_s25 = smov 8   ;;  %s1772_s19 = smov 128  }
  0x65   : > { %913 = dma.hbm_to_vmem [thread:$0]  (!%p1313_p4), %s1365_s22, 1024, %s1374_s9, %s213_s2, %s1772_s19, %s1772_s19, %s1771_s25  }
  0x66   : > { %s1404_s20 = scalar_lea.hbm %s1742_s3, %s1308_s15  ;;  %s258_s8 = scalar_lea.vmem [#allocation11], %s1311_s16 }
  0x67   : > { %s265_s23 = sshll.u32 %s258_s8, 4  ;;  %s1038_s10 = scalar_lea.hbm %s1404_s20, 1024  ;;  %s266_s23 = int_to_ptr.vmem [resolvable:$true] %s265_s23 }
  0x68   : > { %p1039_p2 = scmp.ne.s32.totalorder %s1404_s20, %s1038_s10  ;;  %s1043_s2 = scalar_lea.hbm %s1742_s3, 2048 }
  0x69   : > { %p1044_p12 = scmp.lt.s32.totalorder %s1404_s20, %s1742_s3  ;;  %p1045_p13 = scmp.lt.s32.totalorder %s1043_s2, %s1038_s10 }
  0x6a   : > { %p1041_p9 = pnand %p1039_p2, %p1334_p7 }
  0x6b   : > { %p1046_p1 = por %p1045_p13, %p1044_p12 }
  0x6c   : > { %p1042_p10 = pneg %p1041_p9 }
  0x6e   : > { %p1047_p6 = pnand %p1046_p1, %p1042_p10 }
  0x70   : > { %1050 = shalt.err (!%p1047_p6)
}
  0x71   : > { %s1051_s21 = scalar_lea.vmem %s266_s23, 1024  ;;  %s1205_s27 = smov [#allocation11]  }
  0x72   : > { %p1052_p8 = scmp.ne.s32.totalorder %s266_s23, %s1051_s21  ;;  %s1056_s8 = sshll.u32 %s1205_s27, 4  ;;  %s1057_s8 = int_to_ptr.vmem [resolvable:$false] %s1056_s8 }
  0x73   : > { %s1058_s28 = scalar_lea.vmem %s1057_s8, 2048  ;;  %p1059_p3 = scmp.lt.s32.totalorder %s266_s23, %s1057_s8 }
  0x74   : > { %p1054_p0 = pnand %p1052_p8, %p1334_p7  ;;  %p1060_p5 = scmp.lt.s32.totalorder %s1058_s28, %s1051_s21 }
  0x76   : > { %p1055_p11 = pneg %p1054_p0  ;;  %p1061_p2 = por %p1060_p5, %p1059_p3 }
  0x78   : > { %p1062_p9 = pnand %p1061_p2, %p1055_p11 }
  0x7a   : > { %1065 = shalt.err (!%p1062_p9)
}
  0x7b   : > { %919 = dma.hbm_to_vmem [thread:$0]  (!%p1313_p4), %s1404_s20, 1024, %s266_s23, %s1328_s24, %s1772_s19, %s1772_s19, %s1771_s25  }
  0x7c   : > { %s1431_s10 = scalar_lea.hbm %s1743_s4, %s1308_s15  ;;  %s279_s28 = scalar_lea.vmem [#allocation12], %s1311_s16 }
  0x7d   : > { %s286_s2 = sshll.u32 %s279_s28, 4  ;;  %s276_s22 = scalar_lea.sflag [#allocation13], %s1305_s14  ;;  %s1434_s2 = int_to_ptr.vmem [resolvable:$true] %s286_s2 }
  0x7e   : > { %s1066_s9 = scalar_lea.hbm %s1431_s10, 1024  ;;  %s1071_s20 = scalar_lea.hbm %s1743_s4, 2048 }
  0x7f   : > { %p1067_p10 = scmp.ne.s32.totalorder %s1431_s10, %s1066_s9  ;;  %p1072_p1 = scmp.lt.s32.totalorder %s1431_s10, %s1743_s4 }
  0x80   : > { %p1073_p6 = scmp.lt.s32.totalorder %s1071_s20, %s1066_s9 }
  0x81   : > { %p1069_p12 = pnand %p1067_p10, %p1334_p7 }
  0x82   : > { %p1074_p8 = por %p1073_p6, %p1072_p1 }
  0x83   : > { %p1070_p13 = pneg %p1069_p12 }
  0x85   : > { %p1075_p0 = pnand %p1074_p8, %p1070_p13 }
  0x87   : > { %1078 = shalt.err (!%p1075_p0)
}
  0x88   : > { %s1079_s14 = scalar_lea.vmem %s1434_s2, 1024  ;;  %s1206_s16 = smov [#allocation12]  }
  0x89   : > { %p1080_p11 = scmp.ne.s32.totalorder %s1434_s2, %s1079_s14  ;;  %s1084_s27 = sshll.u32 %s1206_s16, 4  ;;  %s1085_s27 = int_to_ptr.vmem [resolvable:$false] %s1084_s27 }
  0x8a   : > { %s1086_s8 = scalar_lea.vmem %s1085_s27, 2048  ;;  %p1087_p2 = scmp.lt.s32.totalorder %s1434_s2, %s1085_s27 }
  0x8b   : > { %p1082_p3 = pnand %p1080_p11, %p1334_p7  ;;  %p1088_p9 = scmp.lt.s32.totalorder %s1086_s8, %s1079_s14 }
  0x8d   : > { %p1083_p5 = pneg %p1082_p3  ;;  %p1089_p10 = por %p1088_p9, %p1087_p2 }
  0x8f   : > { %p1090_p12 = pnand %p1089_p10, %p1083_p5 }
  0x91   : > { %1093 = shalt.err (!%p1090_p12)
}
  0x92   : > { %922 = dma.hbm_to_vmem [thread:$0]  (!%p1313_p4), %s1431_s10, 1024, %s1434_s2, %s276_s22, %s1772_s19, %s1772_s19, %s1771_s25  }
  0x93   : > { %p1773_p7 = scmp.ne.s32.totalorder %s1770_s18, 0 }
  0x94   : > { %s1463_s30 = sand.u32 (!%p1773_p7), 1, %s1190_s26   ;;  %p1774_p13 = scmp.ne.s32.totalorder (!%p1773_p7), %s1762_s11, 0 }
  0x95   : > { %298 = sbr.rel (%p1773_p7) target bundleno = 468 (0x1d4), region = 36  ;;  %s1466_s1 = sshll.u32 (!%p1773_p7), %s1463_s30, 6 }
  0x96   : > { %s301_s7 = scalar_lea.sflag (!%p1773_p7), [#allocation7], %s1463_s30  ;;  %s1470_s17 = scalar_lea.vmem (!%p1773_p7), [#allocation6], %s1466_s1 }
  0x9a   : > { %1165 = dma.done.wait (%p1774_p13), %s301_s7, 1024  }
  0x9b   : > { %1167 = vsyncadd (%p1774_p13), %s301_s7, 4294966272  ;;  %s309_s18 = sand.u32 1, %s1271_s29   ;;  %s1478_s19 = scalar_lea.vmem [#allocation9], %s1466_s1 }
  0x9c   : > { %s310_s25 = scalar_lea.sflag [#allocation10], %s309_s18 }
  0x9d   : > { %1169 = dma.done.wait (%p1774_p13), %s310_s25, 2048  }
  0x9e   : > { %1171 = vsyncadd (%p1774_p13), %s310_s25, 4294965248  ;;  %s1485_s10 = scalar_lea.vmem [#allocation11], %s1466_s1  ;;  %s328_s28 = scalar_lea.sflag [#allocation13], %s1463_s30 }
  0x9f   : > { %s1489_s2 = scalar_lea.vmem [#allocation12], %s1466_s1 }
  0xa0   : > { %1173 = dma.done.wait (%p1774_p13), %s328_s28, 1024  }
  0xa1   : > { %1175 = vsyncadd (%p1774_p13), %s328_s28, 4294966272  ;;  %v1207_v0 = vmov 0.0   ;;  %v465_v1 = vld [vmem:[%s1489_s2 + $0x10] sm:$0xff]  ;;  %v463_v2 = vld [vmem:[%s1489_s2] sm:$0xff]  ;;  %s1208_s11 = smov 8   ;;  %vm454_vm0 = vcmask 195648  }
  0xa2   : > { %399 = vst [vmem:[#allocation3 + $0x28] sm:$0xff] %v1207_v0  ;;  %378 = vst [vmem:[#allocation2] sm:$0xff] %v1207_v0  ;;  %483 = vrot.lane.b32.xlu1 %v465_v1, %s1208_s11  ;;  %479 = vrot.lane.b32.xlu0 %v463_v2, %s1208_s11  ;;  %v466_v3 = vld [vmem:[%s1489_s2 + $0x18] sm:$0xff]  ;;  %v464_v4 = vld [vmem:[%s1489_s2 + $0x8] sm:$0xff]  ;;  %s883_s22 = sshll.u32 %s1271_s29, 7  ;;  %vm612_vm1 = vcmask 130048  }
  0xa3   : > { %379 = vst [vmem:[#allocation2 + $0x8] sm:$0xff] %v1207_v0  ;;  %380 = vst [vmem:[#allocation2 + $0x10] sm:$0xff] %v1207_v0  ;;  %v468_v5 = vld [vmem:[%s1489_s2 + $0x28] sm:$0xff]  ;;  %v467_v6 = vld [vmem:[%s1489_s2 + $0x20] sm:$0xff]  ;;  %s412_s9 = sadd.s32 1, %s883_s22  ;;  %s1534_s24 = sld [smem:[#allocation5 + %s883_s22]] }
  0xa4   : > { %381 = vst [vmem:[#allocation2 + $0x18] sm:$0xff] %v1207_v0  ;;  %382 = vst [vmem:[#allocation2 + $0x20] sm:$0xff] %v1207_v0  ;;  %v470_v7 = vld [vmem:[%s1489_s2 + $0x38] sm:$0xff]  ;;  %v469_v8 = vld [vmem:[%s1489_s2 + $0x30] sm:$0xff]  ;;  %s413_s21 = sld [smem:[#allocation5 + %s412_s9]]  ;;  %s1578_s16 = scalar_lea.vmem [#allocation15], %s1466_s1 }
  0xa5   : > { %383 = vst [vmem:[#allocation2 + $0x28] sm:$0xff] %v1207_v0  ;;  %384 = vst [vmem:[#allocation2 + $0x30] sm:$0xff] %v1207_v0  ;;  %v415_v9 = vld [vmem:[%s1485_s10 + $0x8] sm:$0xff]  ;;  %v414_v10 = vld [vmem:[%s1485_s10] sm:$0xff]  ;;  %s896_s27 = sshll.u32 %s1271_s29, 10  ;;  %s688_s8 = sshll.u32 %s1578_s16, 4  ;;  %s1622_s8 = int_to_ptr.vmem [resolvable:$true] %s688_s8 }
  0xa6   : > { %385 = vst [vmem:[#allocation2 + $0x38] sm:$0xff] %v1207_v0  ;;  %386 = vst [vmem:[#allocation2 + $0x40] sm:$0xff] %v1207_v0  ;;  %485 = vrot.lane.b32.xlu1 %v466_v3, %s1208_s11  ;;  %481 = vrot.lane.b32.xlu0 %v464_v4, %s1208_s11  ;;  %v417_v11 = vld [vmem:[%s1485_s10 + $0x18] sm:$0xff]  ;;  %v416_v12 = vld [vmem:[%s1485_s10 + $0x10] sm:$0xff]  ;;  %s1620_s25 = scalar_lea.hbm %s1745_s6, %s896_s27  ;;  %s1094_s28 = scalar_lea.vmem %s1622_s8, 1024 }
  0xa7   : > { %387 = vst [vmem:[#allocation2 + $0x48] sm:$0xff] %v1207_v0  ;;  %388 = vst [vmem:[#allocation2 + $0x50] sm:$0xff] %v1207_v0  ;;  %v419_v13 = vld [vmem:[%s1485_s10 + $0x28] sm:$0xff]  ;;  %v418_v14 = vld [vmem:[%s1485_s10 + $0x20] sm:$0xff]  ;;  %p1095_p4 = scmp.ne.s32.totalorder %s1622_s8, %s1094_s28  ;;  %p1775_p1 = scmp.ne.s32.totalorder %s1763_s12, 0 }
  0xa8   : > { %389 = vst [vmem:[#allocation2 + $0x58] sm:$0xff] %v1207_v0  ;;  %390 = vst [vmem:[#allocation2 + $0x60] sm:$0xff] %v1207_v0  ;;  %v421_v15 = vld [vmem:[%s1485_s10 + $0x38] sm:$0xff]  ;;  %v420_v16 = vld [vmem:[%s1485_s10 + $0x30] sm:$0xff]  ;;  %s659_s10 = scalar_lea.sflag [#allocation16], %s1463_s30 }
  0xa9   : > { %391 = vst [vmem:[#allocation2 + $0x68] sm:$0xff] %v1207_v0  ;;  %392 = vst [vmem:[#allocation2 + $0x70] sm:$0xff] %v1207_v0  ;;  %s539_s15 = scalar_lea.vmem [#allocation3], %s1534_s24  ;;  %s511_s14 = scalar_lea.vmem [#allocation2], %s1534_s24  ;;  %v573_v49 = vld [vmem:[%s1478_s19 + $0x8] sm:$0xff]  ;;  %v572_v50 = vld [vmem:[%s1478_s19] sm:$0xff] }
  0xaa   : > { %393 = vst [vmem:[#allocation2 + $0x78] sm:$0xff] %v1207_v0  ;;  %394 = vst [vmem:[#allocation3] sm:$0xff] %v1207_v0  ;;  %489 = vrot.lane.b32.xlu1 %v468_v5, %s1208_s11  ;;  %487 = vrot.lane.b32.xlu0 %v467_v6, %s1208_s11  ;;  %s520_s20 = ssub.s32 128, %s413_s21  ;;  %v575_v55 = vld [vmem:[%s1478_s19 + $0x18] sm:$0xff]  ;;  %v574_v58 = vld [vmem:[%s1478_s19 + $0x10] sm:$0xff]  ;;  %p1096_p6 = pnand %p1095_p4, %p1775_p1 }
  0xab   : > { %395 = vst [vmem:[#allocation3 + $0x8] sm:$0xff] %v1207_v0  ;;  %396 = vst [vmem:[#allocation3 + $0x10] sm:$0xff] %v1207_v0  ;;  %s1540_s23 = sand.u32 127, %s520_s20   ;;  %v577_v1 = vld [vmem:[%s1478_s19 + $0x28] sm:$0xff]  ;;  %v576_v3 = vld [vmem:[%s1478_s19 + $0x20] sm:$0xff] }
  0xac   : > { %397 = vst [vmem:[#allocation3 + $0x18] sm:$0xff] %v1207_v0  ;;  %398 = vst [vmem:[#allocation3 + $0x20] sm:$0xff] %v1207_v0  ;;  %p1097_p8 = pneg %p1096_p6 }
  0xad   : > { %400 = vst [vmem:[#allocation3 + $0x30] sm:$0xff] %v1207_v0  ;;  %401 = vst [vmem:[#allocation3 + $0x38] sm:$0xff] %v1207_v0 }
  0xae   : > { %402 = vst [vmem:[#allocation3 + $0x40] sm:$0xff] %v1207_v0  ;;  %403 = vst [vmem:[#allocation3 + $0x48] sm:$0xff] %v1207_v0  ;;  %493 = vrot.lane.b32.xlu1 %v470_v7, %s1208_s11  ;;  %491 = vrot.lane.b32.xlu0 %v469_v8, %s1208_s11 }
  0xaf   : > { %404 = vst [vmem:[#allocation3 + $0x50] sm:$0xff] %v1207_v0  ;;  %405 = vst [vmem:[#allocation3 + $0x58] sm:$0xff] %v1207_v0 }
  0xb0   : > { %406 = vst [vmem:[#allocation3 + $0x60] sm:$0xff] %v1207_v0  ;;  %407 = vst [vmem:[#allocation3 + $0x68] sm:$0xff] %v1207_v0 }
  0xb1   : > { %408 = vst [vmem:[#allocation3 + $0x70] sm:$0xff] %v1207_v0  ;;  %409 = vst [vmem:[#allocation3 + $0x78] sm:$0xff] %v1207_v0 }
  0xb2   : > { %432 = vrot.lane.b32.xlu1 %v415_v9, %s1208_s11  ;;  %430 = vrot.lane.b32.xlu0 %v414_v10, %s1208_s11 }
  0xb6   : > { %436 = vrot.lane.b32.xlu1 %v417_v11, %s1208_s11  ;;  %434 = vrot.lane.b32.xlu0 %v416_v12, %s1208_s11  ;;  %v579_v11 = vld [vmem:[%s1478_s19 + $0x38] sm:$0xff] }
  0xba   : > { %440 = vrot.lane.b32.xlu1 %v419_v13, %s1208_s11  ;;  %438 = vrot.lane.b32.xlu0 %v418_v14, %s1208_s11  ;;  %v578_v13 = vld [vmem:[%s1478_s19 + $0x30] sm:$0xff]  ;;  %s1633_s19 = scalar_lea.vmem [#allocation14], %s1466_s1  ;;  %s1209_s1 = smov [#allocation15]  }
  0xbb   : > { %s1098_s2 = sshll.u32 %s1209_s1, 4  ;;  %s1099_s2 = int_to_ptr.vmem [resolvable:$false] %s1098_s2 }
  0xbc   : > { %s1100_s22 = scalar_lea.vmem %s1099_s2, 2048  ;;  %p1101_p0 = scmp.lt.s32.totalorder %s1622_s8, %s1099_s2 }
  0xbd   : > { %p1102_p11 = scmp.lt.s32.totalorder %s1100_s22, %s1094_s28 }
  0xbe   : > { %444 = vrot.lane.b32.xlu1 %v421_v15, %s1208_s11  ;;  %442 = vrot.lane.b32.xlu0 %v420_v16, %s1208_s11 }
  0xbf   : > { %p1103_p3 = por %p1102_p11, %p1101_p0 }
  0xc1   : > { %p1104_p5 = pnand %p1103_p3, %p1097_p8 }
 0x114   : > { %v484_v17 = vpop.permute.xlu1 %483  ;;  %v480_v18 = vpop.permute.xlu0 %479 }
 0x115   : > { %505 = vst.msk [vmem:[#allocation3 + $0x28] sm:$0xff] %vm454_vm0, %v484_v17  ;;  %503 = vst.msk [vmem:[#allocation3 + $0x8] sm:$0xff] %vm454_vm0, %v480_v18 }
 0x118   : > { %v486_v19 = vpop.permute.xlu1 %485  ;;  %v482_v20 = vpop.permute.xlu0 %481 }
 0x119   : > { %506 = vst.msk [vmem:[#allocation3 + $0x30] sm:$0xff] %vm454_vm0, %v486_v19  ;;  %504 = vst.msk [vmem:[#allocation3 + $0x10] sm:$0xff] %vm454_vm0, %v482_v20 }
 0x11c   : > { %v490_v21 = vpop.permute.xlu1 %489  ;;  %v488_v22 = vpop.permute.xlu0 %487 }
 0x11d   : > { %508 = vst.msk [vmem:[#allocation3 + $0x50] sm:$0xff] %vm454_vm0, %v490_v21  ;;  %507 = vst.msk [vmem:[#allocation3 + $0x48] sm:$0xff] %vm454_vm0, %v488_v22  ;;  %v565_v21 = vld [vmem:[%s1470_s17 + $0x8] sm:$0xff]  ;;  %v564_v22 = vld [vmem:[%s1470_s17] sm:$0xff] }
 0x120   : > { %v494_v23 = vpop.permute.xlu1 %493  ;;  %v492_v24 = vpop.permute.xlu0 %491 }
 0x121   : > { %510 = vst.msk [vmem:[#allocation3 + $0x70] sm:$0xff] %vm454_vm0, %v494_v23  ;;  %509 = vst.msk [vmem:[#allocation3 + $0x68] sm:$0xff] %vm454_vm0, %v492_v24 }
 0x124   : > { %v433_v25 = vpop.permute.xlu1 %432  ;;  %v431_v26 = vpop.permute.xlu0 %430 }
 0x125   : > { %456 = vst.msk [vmem:[#allocation2 + $0x10] sm:$0xff] %vm454_vm0, %v433_v25  ;;  %455 = vst.msk [vmem:[#allocation2 + $0x8] sm:$0xff] %vm454_vm0, %v431_v26 }
 0x128   : > { %v437_v27 = vpop.permute.xlu1 %436  ;;  %v435_v28 = vpop.permute.xlu0 %434  ;;  %v541_v29 = vld [vmem:[%s539_s15 + $0x8] sm:$0xff]  ;;  %v540_v30 = vld [vmem:[%s539_s15] sm:$0xff] }
 0x129   : > { %458 = vst.msk [vmem:[#allocation2 + $0x30] sm:$0xff] %vm454_vm0, %v437_v27  ;;  %457 = vst.msk [vmem:[#allocation2 + $0x28] sm:$0xff] %vm454_vm0, %v435_v28  ;;  %550 = vrot.lane.b32.xlu1 %v541_v29, %s1540_s23  ;;  %548 = vrot.lane.b32.xlu0 %v540_v30, %s1540_s23  ;;  %v543_v33 = vld [vmem:[%s539_s15 + $0x28] sm:$0xff]  ;;  %v542_v34 = vld [vmem:[%s539_s15 + $0x20] sm:$0xff] }
 0x12a   : > { %v545_v37 = vld [vmem:[%s539_s15 + $0x48] sm:$0xff]  ;;  %v544_v38 = vld [vmem:[%s539_s15 + $0x40] sm:$0xff] }
 0x12b   : > { %v547_v39 = vld [vmem:[%s539_s15 + $0x68] sm:$0xff]  ;;  %v546_v40 = vld [vmem:[%s539_s15 + $0x60] sm:$0xff] }
 0x12c   : > { %v441_v31 = vpop.permute.xlu1 %440  ;;  %v439_v32 = vpop.permute.xlu0 %438 }
 0x12d   : > { %460 = vst.msk [vmem:[#allocation2 + $0x50] sm:$0xff] %vm454_vm0, %v441_v31  ;;  %459 = vst.msk [vmem:[#allocation2 + $0x48] sm:$0xff] %vm454_vm0, %v439_v32  ;;  %554 = vrot.lane.b32.xlu1 %v543_v33, %s1540_s23  ;;  %552 = vrot.lane.b32.xlu0 %v542_v34, %s1540_s23 }
 0x130   : > { %v445_v35 = vpop.permute.xlu1 %444  ;;  %v443_v36 = vpop.permute.xlu0 %442 }
 0x131   : > { %462 = vst.msk [vmem:[#allocation2 + $0x70] sm:$0xff] %vm454_vm0, %v445_v35  ;;  %461 = vst.msk [vmem:[#allocation2 + $0x68] sm:$0xff] %vm454_vm0, %v443_v36  ;;  %558 = vrot.lane.b32.xlu1 %v545_v37, %s1540_s23  ;;  %556 = vrot.lane.b32.xlu0 %v544_v38, %s1540_s23  ;;  %v567_v37 = vld [vmem:[%s1470_s17 + $0x18] sm:$0xff]  ;;  %v566_v38 = vld [vmem:[%s1470_s17 + $0x10] sm:$0xff] }
 0x135   : > { %562 = vrot.lane.b32.xlu1 %v547_v39, %s1540_s23  ;;  %560 = vrot.lane.b32.xlu0 %v546_v40, %s1540_s23 }
 0x138   : > { %v513_v41 = vld [vmem:[%s511_s14 + $0x8] sm:$0xff]  ;;  %v512_v42 = vld [vmem:[%s511_s14] sm:$0xff] }
 0x139   : > { %525 = vrot.lane.b32.xlu1 %v513_v41, %s1540_s23  ;;  %523 = vrot.lane.b32.xlu0 %v512_v42, %s1540_s23  ;;  %v515_v43 = vld [vmem:[%s511_s14 + $0x28] sm:$0xff]  ;;  %v514_v44 = vld [vmem:[%s511_s14 + $0x20] sm:$0xff] }
 0x13a   : > { %v517_v45 = vld [vmem:[%s511_s14 + $0x48] sm:$0xff]  ;;  %v516_v46 = vld [vmem:[%s511_s14 + $0x40] sm:$0xff] }
 0x13b   : > { %v519_v47 = vld [vmem:[%s511_s14 + $0x68] sm:$0xff]  ;;  %v518_v48 = vld [vmem:[%s511_s14 + $0x60] sm:$0xff] }
 0x13d   : > { %529 = vrot.lane.b32.xlu1 %v515_v43, %s1540_s23  ;;  %527 = vrot.lane.b32.xlu0 %v514_v44, %s1540_s23 }
 0x141   : > { %533 = vrot.lane.b32.xlu1 %v517_v45, %s1540_s23  ;;  %531 = vrot.lane.b32.xlu0 %v516_v46, %s1540_s23  ;;  %v569_v45 = vld [vmem:[%s1470_s17 + $0x28] sm:$0xff]  ;;  %v568_v46 = vld [vmem:[%s1470_s17 + $0x20] sm:$0xff] }
 0x145   : > { %537 = vrot.lane.b32.xlu1 %v519_v47, %s1540_s23  ;;  %535 = vrot.lane.b32.xlu0 %v518_v48, %s1540_s23 }
 0x19b   : > { %v551_v51 = vpop.permute.xlu1 %550  ;;  %v549_v52 = vpop.permute.xlu0 %548 }
 0x19c   : > { %v622_v53 = vadd.f32 %v573_v49, %v551_v51  ;;  %v621_v54 = vadd.f32 %v572_v50, %v549_v52  ;;  %v581_v14 = vsub.f32 1.0, %v551_v51  ;;  %v580_v15 = vsub.f32 1.0, %v549_v52 }
 0x19e   : > { %v630_v56 = vmax.f32 %v622_v53, 0.0  ;;  %v629_v57 = vmax.f32 %v621_v54, 0.0  ;;  %v589_v28 = vmul.f32 %v581_v14, %v565_v21  ;;  %v588_v30 = vmul.f32 %v580_v15, %v564_v22 }
 0x19f   : > { %v1570_v59 = vpop.permute.xlu1 %554  ;;  %v1572_v60 = vpop.permute.xlu0 %552 }
 0x1a0   : > { %v638_v61 = vmin.f32 %v630_v56, 1.0  ;;  %v637_v62 = vmin.f32 %v629_v57, 1.0  ;;  %v624_v63 = vadd.f32 %v575_v55, %v1570_v59  ;;  %v623_v0 = vadd.f32 %v574_v58, %v1572_v60 }
 0x1a1   : > { %v583_v26 = vsub.f32 1.0, %v1570_v59  ;;  %v582_v32 = vsub.f32 1.0, %v1572_v60 }
 0x1a2   : > { %646 = vst.msk [vmem:[%s1578_s16 + $0x8] sm:$0xff] %vm612_vm1, %v638_v61  ;;  %645 = vst.msk [vmem:[%s1578_s16] sm:$0xff] %vm612_vm1, %v637_v62  ;;  %v632_v2 = vmax.f32 %v624_v63, 0.0  ;;  %v631_v4 = vmax.f32 %v623_v0, 0.0 }
 0x1a3   : > { %v1585_v5 = vpop.permute.xlu1 %558  ;;  %v1587_v6 = vpop.permute.xlu0 %556  ;;  %v591_v47 = vmul.f32 %v583_v26, %v567_v37  ;;  %v590_v49 = vmul.f32 %v582_v32, %v566_v38 }
 0x1a4   : > { %v640_v7 = vmin.f32 %v632_v2, 1.0  ;;  %v626_v8 = vadd.f32 %v577_v1, %v1585_v5  ;;  %v639_v9 = vmin.f32 %v631_v4, 1.0  ;;  %v625_v10 = vadd.f32 %v576_v3, %v1587_v6 }
 0x1a5   : > { %v585_v41 = vsub.f32 1.0, %v1585_v5  ;;  %v584_v42 = vsub.f32 1.0, %v1587_v6 }
 0x1a6   : > { %648 = vst.msk [vmem:[%s1578_s16 + $0x18] sm:$0xff] %vm612_vm1, %v640_v7  ;;  %v634_v12 = vmax.f32 %v626_v8, 0.0  ;;  %647 = vst.msk [vmem:[%s1578_s16 + $0x10] sm:$0xff] %vm612_vm1, %v639_v9  ;;  %v633_v16 = vmax.f32 %v625_v10, 0.0 }
 0x1a7   : > { %v1597_v17 = vpop.permute.xlu1 %562  ;;  %v1599_v18 = vpop.permute.xlu0 %560 }
 0x1a8   : > { %v642_v19 = vmin.f32 %v634_v12, 1.0  ;;  %v628_v20 = vadd.f32 %v579_v11, %v1597_v17  ;;  %v641_v23 = vmin.f32 %v633_v16, 1.0  ;;  %v627_v24 = vadd.f32 %v578_v13, %v1599_v18 }
 0x1aa   : > { %650 = vst.msk [vmem:[%s1578_s16 + $0x28] sm:$0xff] %vm612_vm1, %v642_v19  ;;  %v636_v25 = vmax.f32 %v628_v20, 0.0  ;;  %649 = vst.msk [vmem:[%s1578_s16 + $0x20] sm:$0xff] %vm612_vm1, %v641_v23  ;;  %v635_v27 = vmax.f32 %v627_v24, 0.0 }
 0x1ab   : > { %v526_v29 = vpop.permute.xlu1 %525  ;;  %v524_v31 = vpop.permute.xlu0 %523 }
 0x1ac   : > { %v644_v33 = vmin.f32 %v636_v25, 1.0  ;;  %v597_v34 = vmul.f32 %v551_v51, %v526_v29  ;;  %v596_v35 = vmul.f32 %v549_v52, %v524_v31  ;;  %v643_v36 = vmin.f32 %v635_v27, 1.0 }
 0x1ae   : > { %652 = vst.msk [vmem:[%s1578_s16 + $0x38] sm:$0xff] %vm612_vm1, %v644_v33  ;;  %v605_v39 = vadd.f32 %v597_v34, %v589_v28  ;;  %v604_v40 = vadd.f32 %v596_v35, %v588_v30  ;;  %651 = vst.msk [vmem:[%s1578_s16 + $0x30] sm:$0xff] %vm612_vm1, %v643_v36 }
 0x1af   : > { %v530_v43 = vpop.permute.xlu1 %529  ;;  %v528_v44 = vpop.permute.xlu0 %527 }
 0x1b0   : > { %614 = vst.msk [vmem:[%s1633_s19 + $0x8] sm:$0xff] %vm612_vm1, %v605_v39  ;;  %613 = vst.msk [vmem:[%s1633_s19] sm:$0xff] %vm612_vm1, %v604_v40  ;;  %v599_v48 = vmul.f32 %v1570_v59, %v530_v43  ;;  %v598_v50 = vmul.f32 %v1572_v60, %v528_v44 }
 0x1b1   : > { %1107 = shalt.err (!%p1104_p5)
}
 0x1b2   : > { %s1108_s9 = scalar_lea.hbm %s1620_s25, 1024  ;;  %s1112_s20 = scalar_lea.hbm %s1745_s6, 2048 }
 0x1b3   : > { %p1109_p2 = scmp.ne.s32.totalorder %s1620_s25, %s1108_s9  ;;  %p1113_p12 = scmp.lt.s32.totalorder %s1620_s25, %s1745_s6 }
 0x1b4   : > { %p1114_p7 = scmp.lt.s32.totalorder %s1112_s20, %s1108_s9 }
 0x1b5   : > { %p1110_p9 = pnand %p1109_p2, %p1775_p1 }
 0x1b6   : > { %p1115_p13 = por %p1114_p7, %p1113_p12 }
 0x1b7   : > { %p1111_p10 = pneg %p1110_p9 }
 0x1b9   : > { %p1116_p4 = pnand %p1115_p13, %p1111_p10 }
 0x1bb   : > { %1119 = shalt.err (!%p1116_p4)
}
 0x1bc   : > { %s1210_s14 = smov 128   ;;  %v607_v51 = vadd.f32 %v599_v48, %v591_v47  ;;  %v606_v52 = vadd.f32 %v598_v50, %v590_v49  ;;  %v593_v53 = vmul.f32 %v585_v41, %v569_v45  ;;  %v534_v54 = vpop.permute.xlu1 %533  ;;  %v592_v55 = vmul.f32 %v584_v42, %v568_v46  ;;  %v532_v56 = vpop.permute.xlu0 %531  ;;  %v571_v61 = vld [vmem:[%s1470_s17 + $0x38] sm:$0xff]  ;;  %v570_v62 = vld [vmem:[%s1470_s17 + $0x30] sm:$0xff]  ;;  %s672_s16 = sshll.u32 %s1633_s19, 4  ;;  %s1691_s16 = int_to_ptr.vmem [resolvable:$true] %s672_s16 }
 0x1bd   : > { %907 = dma.vmem_to_hbm [thread:$0]  (%p1775_p1), %s1622_s8, 1024, %s1620_s25, %s659_s10, %s1210_s14, %s1210_s14, %s1208_s11   ;;  %v587_v57 = vsub.f32 1.0, %v1597_v17  ;;  %v586_v58 = vsub.f32 1.0, %v1599_v18  ;;  %v601_v59 = vmul.f32 %v1585_v5, %v534_v54  ;;  %v600_v60 = vmul.f32 %v1587_v6, %v532_v56 }
 0x1be   : > { %616 = vst.msk [vmem:[%s1633_s19 + $0x18] sm:$0xff] %vm612_vm1, %v607_v51  ;;  %615 = vst.msk [vmem:[%s1633_s19 + $0x10] sm:$0xff] %vm612_vm1, %v606_v52  ;;  %s1689_s7 = scalar_lea.hbm %s1744_s5, %s896_s27  ;;  %s654_s18 = scalar_lea.sflag [#allocation8], %s1463_s30 }
 0x1bf   : > { %v609_v63 = vadd.f32 %v601_v59, %v593_v53  ;;  %v608_v0 = vadd.f32 %v600_v60, %v592_v55  ;;  %v595_v3 = vmul.f32 %v587_v57, %v571_v61  ;;  %v594_v5 = vmul.f32 %v586_v58, %v570_v62  ;;  %s1120_s25 = scalar_lea.vmem %s1691_s16, 1024  ;;  %s1211_s29 = smov [#allocation14]  }
 0x1c0   : > { %v538_v1 = vpop.permute.xlu1 %537  ;;  %v536_v2 = vpop.permute.xlu0 %535  ;;  %p1121_p6 = scmp.ne.s32.totalorder %s1691_s16, %s1120_s25  ;;  %s1124_s10 = sshll.u32 %s1211_s29, 4  ;;  %s1125_s10 = int_to_ptr.vmem [resolvable:$false] %s1124_s10 }
 0x1c1   : > { %618 = vst.msk [vmem:[%s1633_s19 + $0x28] sm:$0xff] %vm612_vm1, %v609_v63  ;;  %617 = vst.msk [vmem:[%s1633_s19 + $0x20] sm:$0xff] %vm612_vm1, %v608_v0  ;;  %v603_v4 = vmul.f32 %v1597_v17, %v538_v1  ;;  %v602_v6 = vmul.f32 %v1599_v18, %v536_v2  ;;  %s1126_s27 = scalar_lea.vmem %s1125_s10, 2048  ;;  %p1127_p11 = scmp.lt.s32.totalorder %s1691_s16, %s1125_s10 }
 0x1c2   : > { %p1122_p8 = pnand %p1121_p6, %p1775_p1  ;;  %p1128_p3 = scmp.lt.s32.totalorder %s1126_s27, %s1120_s25 }
 0x1c3   : > { %v611_v7 = vadd.f32 %v603_v4, %v595_v3  ;;  %v610_v8 = vadd.f32 %v602_v6, %v594_v5 }
 0x1c4   : > { %p1123_p0 = pneg %p1122_p8  ;;  %p1129_p5 = por %p1128_p3, %p1127_p11 }
 0x1c5   : > { %620 = vst.msk [vmem:[%s1633_s19 + $0x38] sm:$0xff] %vm612_vm1, %v611_v7  ;;  %619 = vst.msk [vmem:[%s1633_s19 + $0x30] sm:$0xff] %vm612_vm1, %v610_v8 }
 0x1c6   : > { %p1130_p2 = pnand %p1129_p5, %p1123_p0 }
 0x1c8   : > { %1133 = shalt.err (!%p1130_p2)
}
 0x1c9   : > { %s1134_s19 = scalar_lea.hbm %s1689_s7, 1024  ;;  %s1138_s1 = scalar_lea.hbm %s1744_s5, 2048 }
 0x1ca   : > { %p1135_p9 = scmp.ne.s32.totalorder %s1689_s7, %s1134_s19  ;;  %p1139_p7 = scmp.lt.s32.totalorder %s1689_s7, %s1744_s5 }
 0x1cb   : > { %p1140_p13 = scmp.lt.s32.totalorder %s1138_s1, %s1134_s19 }
 0x1cc   : > { %p1136_p10 = pnand %p1135_p9, %p1775_p1 }
 0x1cd   : > { %p1141_p4 = por %p1140_p13, %p1139_p7 }
 0x1ce   : > { %p1137_p12 = pneg %p1136_p10 }
 0x1d0   : > { %p1142_p6 = pnand %p1141_p4, %p1137_p12 }
 0x1d2   : > { %1145 = shalt.err (!%p1142_p6)
}
 0x1d3   : > { %906 = dma.vmem_to_hbm [thread:$0]  (%p1775_p1), %s1691_s16, 1024, %s1689_s7, %s654_s18, %s1210_s14, %s1210_s14, %s1208_s11  }
 0x1d4 PF: > { %s1776_s9 = sld [smem:[#allocation24_spill]]  ;;  %s703_s21 = sand.u32 1, %s1186_s0  }
 0x1d5   : > { %p1777_p8 = scmp.ne.s32.totalorder %s1764_s13, 0  ;;  %s704_s24 = scalar_lea.sflag [#allocation8], %s703_s21 }
 0x1da   : > { %p1778_p0 = scmp.ge.s32.totalorder %s1776_s9, 2 }
 0x1dc   : > { %p924_p11 = pnand %p1778_p0, %p1777_p8 }
 0x1de   : > { %p925_p3 = pneg %p924_p11 }
 0x1e0   : > { %1177 = dma.done.wait (%p925_p3), %s704_s24, 1024  }
 0x1e1   : > { %1179 = vsyncadd (%p925_p3), %s704_s24, 4294966272  ;;  %s713_s20 = scalar_lea.sflag [#allocation16], %s703_s21 }
 0x1e2   : > { %1181 = dma.done.wait (%p925_p3), %s713_s20, 1024  }
 0x1e3   : > { %1183 = vsyncadd (%p925_p3), %s713_s20, 4294966272  ;;  %s1779_s28 = sld [smem:[#allocation25_spill]]  ;;  %s1782_s0 = smov %s1190_s26 }
 0x1e4   : > { %s1780_s12 = sld [smem:[#allocation23_spill]] }
 0x1e5   : > { %s1781_s27 = sld [smem:[#allocation26_spill]] }
 0x1e9   : > { %p35_p1 = scmp.ge.s32.totalorder %s1779_s28, 4  }
 0x1ea   : > { %s1783_s26 = smov %s1780_s12 }
 0x1eb   :  { %37 = sbr.rel (!%p35_p1) target bundleno = 27 (0x1b), region = 137 }
 0x1f0   :  { %718 = vsyncpa [#allocation7], 1 }
 0x1f1   :  { %720 = vsyncpa [#allocation7 + $0x1], 1 }
 0x1f2   :  { %721 = vsyncpa [#allocation10], 1 }
 0x1f3   :  { %723 = vsyncpa [#allocation10 + $0x1], 1 }
 0x1f4   :  { %724 = vsyncpa [#allocation13], 1 }
 0x1f5   :  { %726 = vsyncpa [#allocation13 + $0x1], 1 }
 0x1f6   :  { %727 = vsyncpa [#allocation8], 1 }
 0x1f7   :  { %729 = vsyncpa [#allocation8 + $0x1], 1 }
 0x1f8   :  { %730 = vsyncpa [#allocation16], 1 }
 0x1f9   :  { %732 = vsyncpa [#allocation16 + $0x1], 1 }

// kernel: sub_policy_stage_pallas.1
= control target key start
LH: loop header
LB: loop body
LE: loop exit
PB: predicated region body
PF: predicated region fallthrough
CT: control target
= control target key end

     0   :  { %s2330_s0 = inlined_call_operand.vmem [shape: s32[2,2], index: 0, kind: input, shape index: {}]   ;;  %s2331_s1 = inlined_call_operand.hbm [shape: f32[2,4,16,16], index: 1, kind: input, shape index: {}]   ;;  %s2332_s2 = inlined_call_operand.hbm [shape: f32[2,4,16,16], index: 2, kind: input, shape index: {}]   ;;  %s2333_s3 = inlined_call_operand.hbm [shape: f32[2,4,16,16], index: 3, kind: input, shape index: {}]   ;;  %s2334_s4 = inlined_call_operand.hbm [shape: f32[2,4,16,16], index: 4, kind: input, shape index: {}]   ;;  %s2335_s5 = inlined_call_operand.hbm [shape: f32[2,4,16,16], index: 5, kind: output, shape index: {0}]   ;;  %s2336_s6 = inlined_call_operand.hbm [shape: f32[2,4,16,16], index: 6, kind: output, shape index: {1}]  }
   0x1   :  { %2347 = sst [smem:[#allocation27_spill]] %s2331_s1  ;;  %s12_s23 = sshll.u32 %s2330_s0, 4  ;;  %s13_s23 = int_to_ptr.vmem [resolvable:$true] %s12_s23 }
   0x2   :  { %2348 = sst [smem:[#allocation28_spill]] %s2332_s2  ;;  %s1399_s24 = scalar_lea.vmem %s13_s23, 32 }
   0x3   :  { %p1400_p0 = scmp.ne.s32.totalorder %s13_s23, %s1399_s24  ;;  %p1404_p1 = scmp.lt.s32.totalorder %s13_s23, %s13_s23 }
   0x4   :  { %p1405_p2 = scmp.lt.s32.totalorder %s1399_s24, %s1399_s24 }
   0x6   :  { %p1406_p3 = por %p1405_p2, %p1404_p1 }
   0x8   :  { %p1407_p4 = pnand %p1406_p3, %p1400_p0 }
   0xa   :  { %1410 = shalt.err (!%p1407_p4)  }
   0xb   :  { %s1629_s25 = smov [#allocation5]  }
   0xc   :  { %15 = dma.vmem_to_smem %s13_s23, 32, %s1629_s25, [#allocation4] }
   0xd   :  { %1591 = dma.done.wait [#allocation4], 32 }
   0xe   :  { %1592 = vsyncadd [#allocation4], 4294967264 }
   0xf   :  { %17 = sfence }
  0x10   :  { %18 = vsyncpa [#allocation7], 0 }
  0x11   :  { %20 = vsyncpa [#allocation7 + $0x1], 0 }
  0x12   :  { %21 = vsyncpa [#allocation10], 0 }
  0x13   :  { %23 = vsyncpa [#allocation10 + $0x1], 0 }
  0x14   :  { %24 = vsyncpa [#allocation13], 0 }
  0x15   :  { %26 = vsyncpa [#allocation13 + $0x1], 0 }
  0x16   :  { %27 = vsyncpa [#allocation8], 0 }
  0x17   :  { %29 = vsyncpa [#allocation8 + $0x1], 0 }
  0x18   :  { %30 = vsyncpa [#allocation16], 0 }
  0x19   :  { %32 = vsyncpa [#allocation16 + $0x1], 0  ;;  %s1680_s0 = smov 0   ;;  %s1682_s26 = smov 0  }
  0x1a   :  { %s1684_s27 = smov 0   ;;  %s1686_s28 = smov 0  }
  0x1b LB: > { %2349 = sst [smem:[#allocation23_spill]] %s1623_s27  ;;  %s1701_s29 = sadd.s32 4294967295, %s1627_s28   ;;  %s1627_s28 = sphi %s1686_s28, %s2370_s28   ;;  %s1623_s27 = sphi %s1684_s27, %s2372_s27   ;;  %s1619_s26 = sphi %s1682_s26, %s2374_s26   ;;  %s1615_s0 = sphi %s1680_s0, %s2373_s0  }
  0x1c   : > { %2350 = sst [smem:[#allocation24_spill]] %s1627_s28  ;;  %s1105_s30 = sadd.s32 4294967294, %s1627_s28  }
  0x1d   : > { %s1705_s7 = sadd.s32 1, %s1627_s28   ;;  %s45_s8 = sadd.s32 1, %s1623_s27 }
  0x1e   : > { %2351 = sst [smem:[#allocation25_spill]] %s1705_s7  ;;  %s42_s9 = ssub.s32 %s1627_s28, %s1705_s7 }
  0x1f   : > { %p52_p5 = scmp.ne.s32.totalorder %s1623_s27, %s1619_s26  ;;  %p43_p6 = scmp.eq.s32.totalorder %s42_s9, 0 }
  0x20   : > { %p53_p7 = scmp.eq.s32.totalorder %s1627_s28, 0  ;;  %p58_p8 = scmp.ne.s32.totalorder %s1619_s26, %s1615_s0 }
  0x21   : > { %p59_p9 = scmp.eq.s32.totalorder %s1701_s29, 0  ;;  %p160_p12 = scmp.eq.s32.totalorder %s1701_s29, 1 }
  0x22   : > { %s1717_s10 = scalar_select %p43_p6, %s1623_s27, %s45_s8  }
  0x23   : > { %p54_p10 = por %p53_p7, %p52_p5  ;;  %p1719_p11 = por %p59_p9, %p58_p8 }
  0x24   : > { %2352 = sst [smem:[#allocation26_spill]] %s1717_s10  ;;  %p166_p13 = scmp.eq.s32.totalorder %s1105_s30, 1 }
  0x25   : > { %s2353_s11 = scalar_select %p1719_p11, 1, 0 }
  0x26   : > { %p1358_p1 = scmp.lt.s32.totalorder %s1627_s28, 2  ;;  %p1726_p2 = por %p160_p12, %p52_p5 }
  0x27   : > { %p1730_p3 = por %p166_p13, %p58_p8  ;;  %s1735_s14 = sand.u32 1, %s1623_s27  }
  0x28   : > { %s2354_s12 = scalar_select %p1726_p2, 1, 0 }
  0x29   : > { %s2355_s13 = scalar_select %p1730_p3, 1, 0 }
  0x2a   : > { %s1738_s15 = sshll.u32 %s1627_s28, 10  ;;  %s1741_s16 = sshll.u32 %s1735_s14, 6 }
  0x2b   : > { %p1743_p4 = pnand %p1358_p1, %p54_p10  ;;  %s233_s18 = sand.u32 1, %s1627_s28  }
  0x2c   : > { %s2357_s2 = sld [smem:[#allocation28_spill]]  ;;  %s237_s22 = scalar_lea.vmem [#allocation9], %s1741_s16 }
  0x2d   : > { %s244_s23 = sshll.u32 %s237_s22, 4  ;;  %s1758_s24 = scalar_lea.sflag [#allocation10], %s233_s18  ;;  %s1755_s23 = int_to_ptr.vmem [resolvable:$true] %s244_s23 }
  0x2e   : > { %p1764_p7 = pneg %p1743_p4 }
  0x32   : > { %s1752_s21 = scalar_lea.hbm %s2357_s2, %s1738_s15  ;;  %s1416_s19 = scalar_lea.hbm %s2357_s2, 2048 }
  0x33   : > { %s1411_s25 = scalar_lea.hbm %s1752_s21, 1024  ;;  %p1417_p10 = scmp.lt.s32.totalorder %s1752_s21, %s2357_s2 }
  0x34   : > { %p1412_p6 = scmp.ne.s32.totalorder %s1752_s21, %s1411_s25  ;;  %p1418_p12 = scmp.lt.s32.totalorder %s1416_s19, %s1411_s25 }
  0x36   : > { %p1414_p8 = pnand %p1764_p7, %p1412_p6  ;;  %p1419_p13 = por %p1418_p12, %p1417_p10 }
  0x38   : > { %p1415_p9 = pneg %p1414_p8 }
  0x3a   : > { %p1420_p1 = pnand %p1419_p13, %p1415_p9 }
  0x3c   : > { %1423 = shalt.err (!%p1420_p1)
}
  0x3d   : > { %s1424_s18 = scalar_lea.vmem %s1755_s23, 1024  ;;  %s1630_s10 = smov [#allocation9]  }
  0x3e   : > { %p1425_p0 = scmp.ne.s32.totalorder %s1755_s23, %s1424_s18  ;;  %s1429_s8 = sshll.u32 %s1630_s10, 4  ;;  %s1430_s8 = int_to_ptr.vmem [resolvable:$false] %s1429_s8 }
  0x3f   : > { %s1431_s9 = scalar_lea.vmem %s1430_s8, 2048  ;;  %p1432_p5 = scmp.lt.s32.totalorder %s1755_s23, %s1430_s8 }
  0x40   : > { %p1427_p6 = pnand %p1425_p0, %p1764_p7  ;;  %p1433_p3 = scmp.lt.s32.totalorder %s1431_s9, %s1424_s18 }
  0x42   : > { %p1428_p8 = pneg %p1427_p6  ;;  %p1434_p2 = por %p1433_p3, %p1432_p5 }
  0x44   : > { %p1435_p11 = pnand %p1434_p2, %p1428_p8 }
  0x46   : > { %1438 = shalt.err (!%p1435_p11)
}
  0x47   : > { %s2339_s25 = smov 128   ;;  %s2341_s19 = smov 8  }
  0x48   : > { %1344 = dma.hbm_to_vmem [thread:$0]  (!%p1743_p4), %s1752_s21, 1024, %s1755_s23, %s1758_s24, %s2339_s25, %s2339_s25, %s2341_s19  }
  0x49   : > { %p294_p0 = scmp.lt.s32.totalorder %s1627_s28, 3  ;;  %s2359_s1 = sld [smem:[#allocation27_spill]] }
  0x4a   : > { %p2360_p11 = scmp.ge.s32.totalorder %s1627_s28, 1  ;;  %s216_s8 = scalar_lea.vmem [#allocation6], %s1741_s16 }
  0x4b   : > { %s223_s9 = sshll.u32 %s216_s8, 4  ;;  %s213_s2 = scalar_lea.sflag [#allocation7], %s1735_s14  ;;  %s1804_s9 = int_to_ptr.vmem [resolvable:$true] %s223_s9 }
  0x4c   : > { %p1799_p2 = pnand %p2360_p11, %p294_p0 }
  0x4e   : > { %s2361_s18 = scalar_select %p1799_p2, 1, 0 }
  0x4f   : > { %s1795_s22 = scalar_lea.hbm %s2359_s1, %s1738_s15  ;;  %s1444_s20 = scalar_lea.hbm %s2359_s1, 2048 }
  0x50   : > { %s1439_s21 = scalar_lea.hbm %s1795_s22, 1024  ;;  %p1445_p10 = scmp.lt.s32.totalorder %s1795_s22, %s2359_s1 }
  0x51   : > { %p1440_p3 = scmp.ne.s32.totalorder %s1795_s22, %s1439_s21  ;;  %p1446_p12 = scmp.lt.s32.totalorder %s1444_s20, %s1439_s21 }
  0x53   : > { %p1442_p5 = pnand %p1440_p3, %p1764_p7  ;;  %p1447_p13 = por %p1446_p12, %p1445_p10 }
  0x55   : > { %p1443_p9 = pneg %p1442_p5 }
  0x57   : > { %p1448_p1 = pnand %p1447_p13, %p1443_p9 }
  0x59   : > { %1451 = shalt.err (!%p1448_p1)
}
  0x5a   : > { %s1452_s8 = scalar_lea.vmem %s1804_s9, 1024  ;;  %s1633_s27 = smov [#allocation6]  }
  0x5b   : > { %p1453_p6 = scmp.ne.s32.totalorder %s1804_s9, %s1452_s8  ;;  %s1457_s23 = sshll.u32 %s1633_s27, 4  ;;  %s1458_s23 = int_to_ptr.vmem [resolvable:$false] %s1457_s23 }
  0x5c   : > { %s1459_s10 = scalar_lea.vmem %s1458_s23, 2048  ;;  %p1460_p11 = scmp.lt.s32.totalorder %s1804_s9, %s1458_s23 }
  0x5d   : > { %p1455_p8 = pnand %p1453_p6, %p1764_p7  ;;  %p1461_p3 = scmp.lt.s32.totalorder %s1459_s10, %s1452_s8 }
  0x5f   : > { %p1456_p0 = pneg %p1455_p8  ;;  %p1462_p5 = por %p1461_p3, %p1460_p11 }
  0x61   : > { %p1463_p2 = pnand %p1462_p5, %p1456_p0 }
  0x63   : > { %1466 = shalt.err (!%p1463_p2)
}
  0x64   : > { %s2362_s25 = smov 8   ;;  %s2363_s19 = smov 128  }
  0x65   : > { %1341 = dma.hbm_to_vmem [thread:$0]  (!%p1743_p4), %s1795_s22, 1024, %s1804_s9, %s213_s2, %s2363_s19, %s2363_s19, %s2362_s25  }
  0x66   : > { %s1834_s20 = scalar_lea.hbm %s2333_s3, %s1738_s15  ;;  %s258_s8 = scalar_lea.vmem [#allocation11], %s1741_s16 }
  0x67   : > { %s265_s23 = sshll.u32 %s258_s8, 4  ;;  %s1467_s10 = scalar_lea.hbm %s1834_s20, 1024  ;;  %s266_s23 = int_to_ptr.vmem [resolvable:$true] %s265_s23 }
  0x68   : > { %p1468_p2 = scmp.ne.s32.totalorder %s1834_s20, %s1467_s10  ;;  %s1472_s2 = scalar_lea.hbm %s2333_s3, 2048 }
  0x69   : > { %p1473_p12 = scmp.lt.s32.totalorder %s1834_s20, %s2333_s3  ;;  %p1474_p13 = scmp.lt.s32.totalorder %s1472_s2, %s1467_s10 }
  0x6a   : > { %p1470_p9 = pnand %p1468_p2, %p1764_p7 }
  0x6b   : > { %p1475_p1 = por %p1474_p13, %p1473_p12 }
  0x6c   : > { %p1471_p10 = pneg %p1470_p9 }
  0x6e   : > { %p1476_p6 = pnand %p1475_p1, %p1471_p10 }
  0x70   : > { %1479 = shalt.err (!%p1476_p6)
}
  0x71   : > { %s1480_s21 = scalar_lea.vmem %s266_s23, 1024  ;;  %s1634_s27 = smov [#allocation11]  }
  0x72   : > { %p1481_p8 = scmp.ne.s32.totalorder %s266_s23, %s1480_s21  ;;  %s1485_s8 = sshll.u32 %s1634_s27, 4  ;;  %s1486_s8 = int_to_ptr.vmem [resolvable:$false] %s1485_s8 }
  0x73   : > { %s1487_s28 = scalar_lea.vmem %s1486_s8, 2048  ;;  %p1488_p3 = scmp.lt.s32.totalorder %s266_s23, %s1486_s8 }
  0x74   : > { %p1483_p0 = pnand %p1481_p8, %p1764_p7  ;;  %p1489_p5 = scmp.lt.s32.totalorder %s1487_s28, %s1480_s21 }
  0x76   : > { %p1484_p11 = pneg %p1483_p0  ;;  %p1490_p2 = por %p1489_p5, %p1488_p3 }
  0x78   : > { %p1491_p9 = pnand %p1490_p2, %p1484_p11 }
  0x7a   : > { %1494 = shalt.err (!%p1491_p9)
}
  0x7b   : > { %1347 = dma.hbm_to_vmem [thread:$0]  (!%p1743_p4), %s1834_s20, 1024, %s266_s23, %s1758_s24, %s2363_s19, %s2363_s19, %s2362_s25  }
  0x7c   : > { %s1861_s10 = scalar_lea.hbm %s2334_s4, %s1738_s15  ;;  %s279_s28 = scalar_lea.vmem [#allocation12], %s1741_s16 }
  0x7d   : > { %s286_s2 = sshll.u32 %s279_s28, 4  ;;  %s276_s22 = scalar_lea.sflag [#allocation13], %s1735_s14  ;;  %s1864_s2 = int_to_ptr.vmem [resolvable:$true] %s286_s2 }
  0x7e   : > { %s1495_s9 = scalar_lea.hbm %s1861_s10, 1024  ;;  %s1500_s20 = scalar_lea.hbm %s2334_s4, 2048 }
  0x7f   : > { %p1496_p10 = scmp.ne.s32.totalorder %s1861_s10, %s1495_s9  ;;  %p1501_p1 = scmp.lt.s32.totalorder %s1861_s10, %s2334_s4 }
  0x80   : > { %p1502_p6 = scmp.lt.s32.totalorder %s1500_s20, %s1495_s9 }
  0x81   : > { %p1498_p12 = pnand %p1496_p10, %p1764_p7 }
  0x82   : > { %p1503_p8 = por %p1502_p6, %p1501_p1 }
  0x83   : > { %p1499_p13 = pneg %p1498_p12 }
  0x85   : > { %p1504_p0 = pnand %p1503_p8, %p1499_p13 }
  0x87   : > { %1507 = shalt.err (!%p1504_p0)
}
  0x88   : > { %s1508_s14 = scalar_lea.vmem %s1864_s2, 1024  ;;  %s1635_s16 = smov [#allocation12]  }
  0x89   : > { %p1509_p11 = scmp.ne.s32.totalorder %s1864_s2, %s1508_s14  ;;  %s1513_s27 = sshll.u32 %s1635_s16, 4  ;;  %s1514_s27 = int_to_ptr.vmem [resolvable:$false] %s1513_s27 }
  0x8a   : > { %s1515_s8 = scalar_lea.vmem %s1514_s27, 2048  ;;  %p1516_p2 = scmp.lt.s32.totalorder %s1864_s2, %s1514_s27 }
  0x8b   : > { %p1511_p3 = pnand %p1509_p11, %p1764_p7  ;;  %p1517_p9 = scmp.lt.s32.totalorder %s1515_s8, %s1508_s14 }
  0x8d   : > { %p1512_p5 = pneg %p1511_p3  ;;  %p1518_p10 = por %p1517_p9, %p1516_p2 }
  0x8f   : > { %p1519_p12 = pnand %p1518_p10, %p1512_p5 }
  0x91   : > { %1522 = shalt.err (!%p1519_p12)
}
  0x92   : > { %1350 = dma.hbm_to_vmem [thread:$0]  (!%p1743_p4), %s1861_s10, 1024, %s1864_s2, %s276_s22, %s2363_s19, %s2363_s19, %s2362_s25  }
  0x93   : > { %p2364_p7 = scmp.ne.s32.totalorder %s2361_s18, 0 }
  0x94   : > { %s1893_s30 = sand.u32 (!%p2364_p7), 1, %s1619_s26   ;;  %p2365_p13 = scmp.ne.s32.totalorder (!%p2364_p7), %s2353_s11, 0 }
  0x95   : > { %298 = sbr.rel (%p2364_p7) target bundleno = 553 (0x229), region = 36  ;;  %s1896_s1 = sshll.u32 (!%p2364_p7), %s1893_s30, 6 }
  0x96   : > { %s301_s7 = scalar_lea.sflag (!%p2364_p7), [#allocation7], %s1893_s30  ;;  %s1900_s17 = scalar_lea.vmem (!%p2364_p7), [#allocation6], %s1896_s1 }
  0x9a   : > { %1594 = dma.done.wait (%p2365_p13), %s301_s7, 1024  }
  0x9b   : > { %1596 = vsyncadd (%p2365_p13), %s301_s7, 4294966272  ;;  %s309_s18 = sand.u32 1, %s1701_s29   ;;  %s1908_s19 = scalar_lea.vmem [#allocation9], %s1896_s1 }
  0x9c   : > { %s310_s25 = scalar_lea.sflag [#allocation10], %s309_s18 }
  0x9d   : > { %1598 = dma.done.wait (%p2365_p13), %s310_s25, 2048  }
  0x9e   : > { %1600 = vsyncadd (%p2365_p13), %s310_s25, 4294965248  ;;  %s1915_s10 = scalar_lea.vmem [#allocation11], %s1896_s1  ;;  %s328_s28 = scalar_lea.sflag [#allocation13], %s1893_s30 }
  0x9f   : > { %s1919_s2 = scalar_lea.vmem [#allocation12], %s1896_s1 }
  0xa0   : > { %1602 = dma.done.wait (%p2365_p13), %s328_s28, 1024  }
  0xa1   : > { %1604 = vsyncadd (%p2365_p13), %s328_s28, 4294966272  ;;  %s1127_s22 = sshll.u32 %s1701_s29, 7  ;;  %v520_v0 = vlaneseq  ;;  %v1636_v1 = vmov 0.0   ;;  %v465_v4 = vld [vmem:[%s1919_s2 + $0x10] sm:$0xff]  ;;  %v463_v5 = vld [vmem:[%s1919_s2] sm:$0xff]  ;;  %s1637_s21 = smov 8  }
  0xa2   : > { %s1928_s9 = sadd.s32 1, %s1127_s22  ;;  %399 = vst [vmem:[#allocation3 + $0x28] sm:$0xff] %v1636_v1  ;;  %378 = vst [vmem:[#allocation2] sm:$0xff] %v1636_v1  ;;  %483 = vrot.lane.b32.xlu1 %v465_v4, %s1637_s21  ;;  %479 = vrot.lane.b32.xlu0 %v463_v5, %s1637_s21  ;;  %v466_v8 = vld [vmem:[%s1919_s2 + $0x18] sm:$0xff]  ;;  %v464_v9 = vld [vmem:[%s1919_s2 + $0x8] sm:$0xff]  ;;  %v1638_v15 = vmov 1.0  }
  0xa3   : > { %379 = vst [vmem:[#allocation2 + $0x8] sm:$0xff] %v1636_v1  ;;  %380 = vst [vmem:[#allocation2 + $0x10] sm:$0xff] %v1636_v1  ;;  %s413_s11 = sld [smem:[#allocation5 + %s1928_s9]]  ;;  %v1931_v2 = vshrl.u32 %v520_v0, 7  ;;  %v538_v3 = vand.u32 127, %v520_v0  ;;  %v468_v13 = vld [vmem:[%s1919_s2 + $0x28] sm:$0xff] }
  0xa4   : > { %381 = vst [vmem:[#allocation2 + $0x18] sm:$0xff] %v1636_v1  ;;  %382 = vst [vmem:[#allocation2 + $0x20] sm:$0xff] %v1636_v1  ;;  %v467_v14 = vld [vmem:[%s1919_s2 + $0x20] sm:$0xff]  ;;  %v470_v18 = vld [vmem:[%s1919_s2 + $0x38] sm:$0xff]  ;;  %s2143_s24 = sld [smem:[#allocation5 + %s1127_s22]]  ;;  %s2168_s15 = scalar_lea.vmem [#allocation15], %s1896_s1 }
  0xa5   : > { %383 = vst [vmem:[#allocation2 + $0x28] sm:$0xff] %v1636_v1  ;;  %384 = vst [vmem:[#allocation2 + $0x30] sm:$0xff] %v1636_v1  ;;  %v536_v6 = vadd.s32 120, %v1931_v2  ;;  %v535_v7 = vadd.s32 112, %v1931_v2  ;;  %v534_v12 = vadd.s32 104, %v1931_v2  ;;  %v533_v16 = vadd.s32 96, %v1931_v2 }
  0xa6   : > { %385 = vst [vmem:[#allocation2 + $0x38] sm:$0xff] %v1636_v1  ;;  %386 = vst [vmem:[#allocation2 + $0x40] sm:$0xff] %v1636_v1  ;;  %485 = vrot.lane.b32.xlu1 %v466_v8, %s1637_s21  ;;  %481 = vrot.lane.b32.xlu0 %v464_v9, %s1637_s21  ;;  %v532_v17 = vadd.s32 88, %v1931_v2  ;;  %v469_v19 = vld [vmem:[%s1919_s2 + $0x30] sm:$0xff]  ;;  %v531_v20 = vadd.s32 80, %v1931_v2  ;;  %v415_v21 = vld [vmem:[%s1915_s10 + $0x8] sm:$0xff] }
  0xa7   : > { %387 = vst [vmem:[#allocation2 + $0x48] sm:$0xff] %v1636_v1  ;;  %388 = vst [vmem:[#allocation2 + $0x50] sm:$0xff] %v1636_v1  ;;  %v414_v22 = vld [vmem:[%s1915_s10] sm:$0xff]  ;;  %v530_v23 = vadd.s32 72, %v1931_v2  ;;  %v529_v24 = vadd.s32 64, %v1931_v2  ;;  %v417_v25 = vld [vmem:[%s1915_s10 + $0x18] sm:$0xff] }
  0xa8   : > { %389 = vst [vmem:[#allocation2 + $0x58] sm:$0xff] %v1636_v1  ;;  %390 = vst [vmem:[#allocation2 + $0x60] sm:$0xff] %v1636_v1  ;;  %v416_v26 = vld [vmem:[%s1915_s10 + $0x10] sm:$0xff]  ;;  %v528_v27 = vadd.s32 56, %v1931_v2  ;;  %v419_v28 = vld [vmem:[%s1915_s10 + $0x28] sm:$0xff]  ;;  %v527_v30 = vadd.s32 48, %v1931_v2 }
  0xa9   : > { %391 = vst [vmem:[#allocation2 + $0x68] sm:$0xff] %v1636_v1  ;;  %392 = vst [vmem:[#allocation2 + $0x70] sm:$0xff] %v1636_v1  ;;  %v539_v10 = vstv %s413_s11  ;;  %v418_v29 = vld [vmem:[%s1915_s10 + $0x20] sm:$0xff]  ;;  %v526_v31 = vadd.s32 40, %v1931_v2  ;;  %v421_v32 = vld [vmem:[%s1915_s10 + $0x38] sm:$0xff]  ;;  %v525_v34 = vadd.s32 32, %v1931_v2 }
  0xaa   : > { %393 = vst [vmem:[#allocation2 + $0x78] sm:$0xff] %v1636_v1  ;;  %394 = vst [vmem:[#allocation3] sm:$0xff] %v1636_v1  ;;  %v1941_v11 = vadd.s32 %v539_v10, %v538_v3  ;;  %489 = vrot.lane.b32.xlu1 %v468_v13, %s1637_s21  ;;  %487 = vrot.lane.b32.xlu0 %v467_v14, %s1637_s21  ;;  %v420_v33 = vld [vmem:[%s1915_s10 + $0x30] sm:$0xff]  ;;  %v524_v35 = vadd.s32 24, %v1931_v2  ;;  %v523_v36 = vadd.s32 16, %v1931_v2  ;;  %v522_v37 = vadd.s32 8, %v1931_v2 }
  0xab   : > { %395 = vst [vmem:[#allocation3 + $0x8] sm:$0xff] %v1636_v1  ;;  %396 = vst [vmem:[#allocation3 + $0x10] sm:$0xff] %v1636_v1  ;;  %s694_s20 = scalar_lea.vmem [#allocation3], %s2143_s24  ;;  %s511_s23 = scalar_lea.vmem [#allocation2], %s2143_s24  ;;  %v816_v8 = vld [vmem:[%s1908_s19] sm:$0xff] }
  0xac   : > { %397 = vst [vmem:[#allocation3 + $0x18] sm:$0xff] %v1636_v1  ;;  %398 = vst [vmem:[#allocation3 + $0x20] sm:$0xff] %v1636_v1  ;;  %vm556_vm0 = vcmp.eq.s32.totalorder %v536_v6, %v1941_v11  ;;  %vm555_vm1 = vcmp.eq.s32.totalorder %v535_v7, %v1941_v11  ;;  %vm554_vm2 = vcmp.eq.s32.totalorder %v534_v12, %v1941_v11  ;;  %v817_v6 = vld [vmem:[%s1908_s19 + $0x8] sm:$0xff]  ;;  %s1188_s14 = sshll.u32 %s1701_s29, 10  ;;  %s932_s16 = sshll.u32 %s2168_s15, 4  ;;  %s2214_s16 = int_to_ptr.vmem [resolvable:$true] %s932_s16 }
  0xad   : > { %400 = vst [vmem:[#allocation3 + $0x30] sm:$0xff] %v1636_v1  ;;  %401 = vst [vmem:[#allocation3 + $0x38] sm:$0xff] %v1636_v1  ;;  %1282 = vmatprep.subr.msk.mxu1 %vm556_vm0, %v1638_v15  ;;  %1238 = vmatprep.subr.msk.mxu0 %vm556_vm0, %v1638_v15  ;;  %vm553_vm3 = vcmp.eq.s32.totalorder %v533_v16, %v1941_v11  ;;  %vm552_vm4 = vcmp.eq.s32.totalorder %v532_v17, %v1941_v11  ;;  %s2212_s7 = scalar_lea.hbm %s2336_s6, %s1188_s14  ;;  %s2221_s18 = scalar_lea.vmem [#allocation14], %s1896_s1 }
  0xae   : > { %402 = vst [vmem:[#allocation3 + $0x40] sm:$0xff] %v1636_v1  ;;  %403 = vst [vmem:[#allocation3 + $0x48] sm:$0xff] %v1636_v1  ;;  %1283 = vmatpush3.msk.msra.mxu1 %vm556_vm0, %v1638_v15  ;;  %1239 = vmatpush3.msk.msra.mxu0 %vm556_vm0, %v1638_v15  ;;  %vm551_vm5 = vcmp.eq.s32.totalorder %v531_v20, %v1941_v11  ;;  %vm550_vm6 = vcmp.eq.s32.totalorder %v530_v23, %v1941_v11  ;;  %vm454_vm0 = vcmask 195648   ;;  %v821_v20 = vld [vmem:[%s1908_s19 + $0x28] sm:$0xff]  ;;  %s903_s25 = scalar_lea.sflag [#allocation16], %s1893_s30  ;;  %p2366_p1 = scmp.ne.s32.totalorder %s2354_s12, 0 }
  0xaf   : > { %404 = vst [vmem:[#allocation3 + $0x50] sm:$0xff] %v1636_v1  ;;  %405 = vst [vmem:[#allocation3 + $0x58] sm:$0xff] %v1636_v1  ;;  %1284 = vmatprep.subr.msk.mxu1 %vm555_vm1, %v1638_v15  ;;  %1240 = vmatprep.subr.msk.mxu0 %vm555_vm1, %v1638_v15  ;;  %vm549_vm7 = vcmp.eq.s32.totalorder %v529_v24, %v1941_v11  ;;  %vm548_vm8 = vcmp.eq.s32.totalorder %v528_v27, %v1941_v11  ;;  %s1639_s10 = smov [#allocation15]  }
  0xb0   : > { %406 = vst [vmem:[#allocation3 + $0x60] sm:$0xff] %v1636_v1  ;;  %407 = vst [vmem:[#allocation3 + $0x68] sm:$0xff] %v1636_v1  ;;  %1285 = vmatpush3.msk.msra.mxu1 %vm555_vm1, %v1638_v15  ;;  %1241 = vmatpush3.msk.msra.mxu0 %vm555_vm1, %v1638_v15  ;;  %vm547_vm9 = vcmp.eq.s32.totalorder %v527_v30, %v1941_v11  ;;  %vm546_vm10 = vcmp.eq.s32.totalorder %v526_v31, %v1941_v11  ;;  %vm856_vm1 = vcmask 130048   ;;  %v823_v30 = vld [vmem:[%s1908_s19 + $0x38] sm:$0xff]  ;;  %s1527_s28 = sshll.u32 %s1639_s10, 4  ;;  %s1528_s28 = int_to_ptr.vmem [resolvable:$false] %s1527_s28 }
  0xb1   : > { %408 = vst [vmem:[#allocation3 + $0x70] sm:$0xff] %v1636_v1  ;;  %409 = vst [vmem:[#allocation3 + $0x78] sm:$0xff] %v1636_v1  ;;  %1286 = vmatprep.subr.msk.mxu1 %vm554_vm2, %v1638_v15  ;;  %1242 = vmatprep.subr.msk.mxu0 %vm554_vm2, %v1638_v15  ;;  %vm545_vm11 = vcmp.eq.s32.totalorder %v525_v34, %v1941_v11  ;;  %vm544_vm12 = vcmp.eq.s32.totalorder %v524_v35, %v1941_v11  ;;  %s1529_s1 = scalar_lea.vmem %s1528_s28, 2048  ;;  %p1530_p0 = scmp.lt.s32.totalorder %s2214_s16, %s1528_s28 }
  0xb2   : > { %1287 = vmatpush3.msk.msra.mxu1 %vm554_vm2, %v1638_v15  ;;  %493 = vrot.lane.b32.xlu1 %v470_v18, %s1637_s21  ;;  %vm543_vm13 = vcmp.eq.s32.totalorder %v523_v36, %v1941_v11  ;;  %vm542_vm14 = vcmp.eq.s32.totalorder %v522_v37, %v1941_v11  ;;  %vm541_vm15 = vcmp.eq.s32.totalorder %v1931_v2, %v1941_v11  ;;  %v819_v11 = vld [vmem:[%s1908_s19 + $0x18] sm:$0xff]  ;;  %v822_v36 = vld [vmem:[%s1908_s19 + $0x30] sm:$0xff] }
  0xb3   : > { %491 = vrot.lane.b32.xlu0 %v469_v19, %s1637_s21  ;;  %1288 = vmatprep.subr.msk.mxu1 %vm553_vm3, %v1638_v15 }
  0xb4   : > { %1243 = vmatpush3.msk.msra.mxu0 %vm554_vm2, %v1638_v15  ;;  %1289 = vmatpush3.msk.msra.mxu1 %vm553_vm3, %v1638_v15 }
  0xb5   : > { %1244 = vmatprep.subr.msk.mxu0 %vm553_vm3, %v1638_v15  ;;  %1290 = vmatprep.subr.msk.mxu1 %vm552_vm4, %v1638_v15 }
  0xb6   : > { %1245 = vmatpush3.msk.msra.mxu0 %vm553_vm3, %v1638_v15  ;;  %432 = vrot.lane.b32.xlu1 %v415_v21, %s1637_s21 }
  0xb7   : > { %430 = vrot.lane.b32.xlu0 %v414_v22, %s1637_s21  ;;  %1291 = vmatpush3.msk.msra.mxu1 %vm552_vm4, %v1638_v15 }
  0xb8   : > { %1246 = vmatprep.subr.msk.mxu0 %vm552_vm4, %v1638_v15  ;;  %1292 = vmatprep.subr.msk.mxu1 %vm551_vm5, %v1638_v15 }
  0xb9   : > { %1247 = vmatpush3.msk.msra.mxu0 %vm552_vm4, %v1638_v15  ;;  %1293 = vmatpush3.msk.msra.mxu1 %vm551_vm5, %v1638_v15 }
  0xba   : > { %1248 = vmatprep.subr.msk.mxu0 %vm551_vm5, %v1638_v15  ;;  %436 = vrot.lane.b32.xlu1 %v417_v25, %s1637_s21  ;;  %v820_v25 = vld [vmem:[%s1908_s19 + $0x20] sm:$0xff] }
  0xbb   : > { %434 = vrot.lane.b32.xlu0 %v416_v26, %s1637_s21  ;;  %1294 = vmatprep.subr.msk.mxu1 %vm550_vm6, %v1638_v15 }
  0xbc   : > { %1249 = vmatpush3.msk.msra.mxu0 %vm551_vm5, %v1638_v15  ;;  %1295 = vmatpush3.msk.msra.mxu1 %vm550_vm6, %v1638_v15 }
  0xbd   : > { %1250 = vmatprep.subr.msk.mxu0 %vm550_vm6, %v1638_v15  ;;  %1296 = vmatprep.subr.msk.mxu1 %vm549_vm7, %v1638_v15 }
  0xbe   : > { %1251 = vmatpush3.msk.msra.mxu0 %vm550_vm6, %v1638_v15  ;;  %440 = vrot.lane.b32.xlu1 %v419_v28, %s1637_s21 }
  0xbf   : > { %438 = vrot.lane.b32.xlu0 %v418_v29, %s1637_s21  ;;  %1297 = vmatpush3.msk.msra.mxu1 %vm549_vm7, %v1638_v15 }
  0xc0   : > { %1252 = vmatprep.subr.msk.mxu0 %vm549_vm7, %v1638_v15  ;;  %1298 = vmatprep.subr.msk.mxu1 %vm548_vm8, %v1638_v15 }
  0xc1   : > { %1253 = vmatpush3.msk.msra.mxu0 %vm549_vm7, %v1638_v15  ;;  %1299 = vmatpush3.msk.msra.mxu1 %vm548_vm8, %v1638_v15 }
  0xc2   : > { %1254 = vmatprep.subr.msk.mxu0 %vm548_vm8, %v1638_v15  ;;  %444 = vrot.lane.b32.xlu1 %v421_v32, %s1637_s21 }
  0xc3   : > { %442 = vrot.lane.b32.xlu0 %v420_v33, %s1637_s21  ;;  %1300 = vmatprep.subr.msk.mxu1 %vm547_vm9, %v1638_v15 }
  0xc4   : > { %1255 = vmatpush3.msk.msra.mxu0 %vm548_vm8, %v1638_v15  ;;  %1301 = vmatpush3.msk.msra.mxu1 %vm547_vm9, %v1638_v15 }
  0xc5   : > { %1256 = vmatprep.subr.msk.mxu0 %vm547_vm9, %v1638_v15  ;;  %1302 = vmatprep.subr.msk.mxu1 %vm546_vm10, %v1638_v15 }
  0xc6   : > { %1257 = vmatpush3.msk.msra.mxu0 %vm547_vm9, %v1638_v15  ;;  %1303 = vmatpush3.msk.msra.mxu1 %vm546_vm10, %v1638_v15 }
  0xc7   : > { %1258 = vmatprep.subr.msk.mxu0 %vm546_vm10, %v1638_v15  ;;  %1304 = vmatprep.subr.msk.mxu1 %vm545_vm11, %v1638_v15 }
  0xc8   : > { %1259 = vmatpush3.msk.msra.mxu0 %vm546_vm10, %v1638_v15  ;;  %1305 = vmatpush3.msk.msra.mxu1 %vm545_vm11, %v1638_v15 }
  0xc9   : > { %1260 = vmatprep.subr.msk.mxu0 %vm545_vm11, %v1638_v15  ;;  %1306 = vmatprep.subr.msk.mxu1 %vm544_vm12, %v1638_v15 }
  0xca   : > { %1261 = vmatpush3.msk.msra.mxu0 %vm545_vm11, %v1638_v15  ;;  %1307 = vmatpush3.msk.msra.mxu1 %vm544_vm12, %v1638_v15 }
  0xcb   : > { %1262 = vmatprep.subr.msk.mxu0 %vm544_vm12, %v1638_v15  ;;  %1308 = vmatprep.subr.msk.mxu1 %vm543_vm13, %v1638_v15 }
  0xcc   : > { %1263 = vmatpush3.msk.msra.mxu0 %vm544_vm12, %v1638_v15  ;;  %1309 = vmatpush3.msk.msra.mxu1 %vm543_vm13, %v1638_v15 }
  0xcd   : > { %1264 = vmatprep.subr.msk.mxu0 %vm543_vm13, %v1638_v15  ;;  %1310 = vmatprep.subr.msk.mxu1 %vm542_vm14, %v1638_v15 }
  0xce   : > { %1265 = vmatpush3.msk.msra.mxu0 %vm543_vm13, %v1638_v15  ;;  %1311 = vmatpush3.msk.msra.mxu1 %vm542_vm14, %v1638_v15 }
  0xcf   : > { %1266 = vmatprep.subr.msk.mxu0 %vm542_vm14, %v1638_v15  ;;  %1312 = vmatprep.subr.msk.mxu1 %vm541_vm15, %v1638_v15 }
  0xd0   : > { %1267 = vmatpush3.msk.msra.mxu0 %vm542_vm14, %v1638_v15  ;;  %1313 = vmatpush3.msk.msra.mxu1 %vm541_vm15, %v1638_v15 }
  0xd1   : > { %1268 = vmatprep.subr.msk.mxu0 %vm541_vm15, %v1638_v15 }
  0xd2   : > { %1269 = vmatpush3.msk.msra.mxu0 %vm541_vm15, %v1638_v15  ;;  %v818_v15 = vld [vmem:[%s1908_s19 + $0x10] sm:$0xff]  ;;  %s1523_s19 = scalar_lea.vmem %s2214_s16, 1024 }
  0xd3   : > { %p1524_p4 = scmp.ne.s32.totalorder %s2214_s16, %s1523_s19  ;;  %p1531_p11 = scmp.lt.s32.totalorder %s1529_s1, %s1523_s19 }
  0xd5   : > { %p1525_p6 = pnand %p1524_p4, %p2366_p1  ;;  %p1532_p3 = por %p1531_p11, %p1530_p0 }
  0xd7   : > { %p1526_p8 = pneg %p1525_p6 }
  0xd9   : > { %p1533_p5 = pnand %p1532_p3, %p1526_p8 }
 0x114   : > { %v484_v38 = vpop.permute.xlu1 %483  ;;  %v480_v39 = vpop.permute.xlu0 %479 }
 0x115   : > { %505 = vst.msk [vmem:[#allocation3 + $0x28] sm:$0xff] %vm454_vm0, %v484_v38  ;;  %503 = vst.msk [vmem:[#allocation3 + $0x8] sm:$0xff] %vm454_vm0, %v480_v39 }
 0x118   : > { %v486_v40 = vpop.permute.xlu1 %485  ;;  %v482_v41 = vpop.permute.xlu0 %481 }
 0x119   : > { %506 = vst.msk [vmem:[#allocation3 + $0x30] sm:$0xff] %vm454_vm0, %v486_v40  ;;  %504 = vst.msk [vmem:[#allocation3 + $0x10] sm:$0xff] %vm454_vm0, %v482_v41  ;;  %v809_v40 = vld [vmem:[%s1900_s17 + $0x8] sm:$0xff] }
 0x11c   : > { %v490_v42 = vpop.permute.xlu1 %489  ;;  %v488_v43 = vpop.permute.xlu0 %487 }
 0x11d   : > { %508 = vst.msk [vmem:[#allocation3 + $0x50] sm:$0xff] %vm454_vm0, %v490_v42  ;;  %507 = vst.msk [vmem:[#allocation3 + $0x48] sm:$0xff] %vm454_vm0, %v488_v43 }
 0x124   : > { %v494_v44 = vpop.permute.xlu1 %493 }
 0x125   : > { %v492_v45 = vpop.permute.xlu0 %491  ;;  %510 = vst.msk [vmem:[#allocation3 + $0x70] sm:$0xff] %vm454_vm0, %v494_v44 }
 0x126   : > { %509 = vst.msk [vmem:[#allocation3 + $0x68] sm:$0xff] %vm454_vm0, %v492_v45 }
 0x128   : > { %v433_v46 = vpop.permute.xlu1 %432 }
 0x129   : > { %v431_v47 = vpop.permute.xlu0 %430  ;;  %456 = vst.msk [vmem:[#allocation2 + $0x10] sm:$0xff] %vm454_vm0, %v433_v46  ;;  %v808_v46 = vld [vmem:[%s1900_s17] sm:$0xff] }
 0x12a   : > { %455 = vst.msk [vmem:[#allocation2 + $0x8] sm:$0xff] %vm454_vm0, %v431_v47 }
 0x12c   : > { %v437_v48 = vpop.permute.xlu1 %436 }
 0x12d   : > { %v435_v49 = vpop.permute.xlu0 %434  ;;  %v695_v50 = vld [vmem:[%s694_s20] sm:$0xff]  ;;  %v696_v51 = vld [vmem:[%s694_s20 + $0x8] sm:$0xff]  ;;  %458 = vst.msk [vmem:[#allocation2 + $0x30] sm:$0xff] %vm454_vm0, %v437_v48 }
 0x12e   : > { %457 = vst.msk [vmem:[#allocation2 + $0x28] sm:$0xff] %vm454_vm0, %v435_v49  ;;  %1314 = vmatprep.mubr.f32.mxu1 %v695_v50  ;;  %v697_v52 = vld [vmem:[%s694_s20 + $0x20] sm:$0xff]  ;;  %v698_v55 = vld [vmem:[%s694_s20 + $0x28] sm:$0xff] }
 0x12f   : > { %1315 = vmatmul.mubr.f32.vlgmr.msra.gmra.mxu1 %v696_v51  ;;  %v699_v56 = vld [vmem:[%s694_s20 + $0x40] sm:$0xff]  ;;  %v700_v59 = vld [vmem:[%s694_s20 + $0x48] sm:$0xff] }
 0x130   : > { %1317 = vmatprep.mubr.f32.mxu1 %v697_v52  ;;  %v441_v53 = vpop.permute.xlu1 %440  ;;  %v701_v60 = vld [vmem:[%s694_s20 + $0x60] sm:$0xff]  ;;  %v702_v61 = vld [vmem:[%s694_s20 + $0x68] sm:$0xff] }
 0x131   : > { %v439_v54 = vpop.permute.xlu0 %438  ;;  %460 = vst.msk [vmem:[#allocation2 + $0x50] sm:$0xff] %vm454_vm0, %v441_v53 }
 0x132   : > { %459 = vst.msk [vmem:[#allocation2 + $0x48] sm:$0xff] %vm454_vm0, %v439_v54 }
 0x133   : > { %1318 = vmatmul.mubr.f32.gmra.mxu1 %v698_v55  ;;  %v811_v55 = vld [vmem:[%s1900_s17 + $0x18] sm:$0xff] }
 0x134   : > { %1320 = vmatprep.mubr.f32.mxu1 %v699_v56  ;;  %v445_v57 = vpop.permute.xlu1 %444 }
 0x135   : > { %v443_v58 = vpop.permute.xlu0 %442  ;;  %462 = vst.msk [vmem:[#allocation2 + $0x70] sm:$0xff] %vm454_vm0, %v445_v57 }
 0x136   : > { %461 = vst.msk [vmem:[#allocation2 + $0x68] sm:$0xff] %vm454_vm0, %v443_v58 }
 0x137   : > { %1321 = vmatmul.mubr.f32.gmra.mxu1 %v700_v59 }
 0x138   : > { %1323 = vmatprep.mubr.f32.mxu1 %v701_v60 }
 0x13b   : > { %1324 = vmatmul.mubr.f32.gmra.mxu1 %v702_v61  ;;  %v810_v61 = vld [vmem:[%s1900_s17 + $0x10] sm:$0xff] }
 0x13d   : > { %v512_v62 = vld [vmem:[%s511_s23] sm:$0xff]  ;;  %v513_v63 = vld [vmem:[%s511_s23 + $0x8] sm:$0xff] }
 0x13e   : > { %1270 = vmatprep.mubr.f32.mxu0 %v512_v62  ;;  %v514_v0 = vld [vmem:[%s511_s23 + $0x20] sm:$0xff]  ;;  %v515_v1 = vld [vmem:[%s511_s23 + $0x28] sm:$0xff] }
 0x13f   : > { %1271 = vmatmul.mubr.f32.vlgmr.msra.gmra.mxu0 %v513_v63  ;;  %v516_v2 = vld [vmem:[%s511_s23 + $0x40] sm:$0xff]  ;;  %v517_v3 = vld [vmem:[%s511_s23 + $0x48] sm:$0xff] }
 0x140   : > { %1273 = vmatprep.mubr.f32.mxu0 %v514_v0  ;;  %v518_v4 = vld [vmem:[%s511_s23 + $0x60] sm:$0xff]  ;;  %v519_v5 = vld [vmem:[%s511_s23 + $0x68] sm:$0xff] }
 0x143   : > { %1274 = vmatmul.mubr.f32.gmra.mxu0 %v515_v1 }
 0x144   : > { %1276 = vmatprep.mubr.f32.mxu0 %v516_v2  ;;  %v813_v2 = vld [vmem:[%s1900_s17 + $0x28] sm:$0xff] }
 0x147   : > { %1277 = vmatmul.mubr.f32.gmra.mxu0 %v517_v3 }
 0x148   : > { %1279 = vmatprep.mubr.f32.mxu0 %v518_v4 }
 0x14b   : > { %1280 = vmatmul.mubr.f32.gmra.mxu0 %v519_v5 }
 0x1ef   : > { %v1316_v7 = vpop.f32.mrf.mxu1 }
 0x1f0   : > { %v866_v9 = vadd.f32 %v1316_v7, %v817_v6  ;;  %v825_v34 = vsub.f32 1.0, %v1316_v7 }
 0x1f1   : > { %v769_v10 = vpop.f32.mrf.mxu1 }
 0x1f2   : > { %v874_v12 = vmax.f32 %v866_v9, 0.0  ;;  %v865_v13 = vadd.f32 %v816_v8, %v769_v10  ;;  %v824_v41 = vsub.f32 1.0, %v769_v10  ;;  %v833_v48 = vmul.f32 %v825_v34, %v809_v40 }
 0x1f3   : > { %v2160_v14 = vpop.f32.mrf.mxu1 }
 0x1f4   : > { %v882_v16 = vmin.f32 %v874_v12, 1.0  ;;  %v873_v17 = vmax.f32 %v865_v13, 0.0  ;;  %v868_v18 = vadd.f32 %v2160_v14, %v819_v11  ;;  %v827_v49 = vsub.f32 1.0, %v2160_v14 }
 0x1f5   : > { %v2164_v19 = vpop.f32.mrf.mxu1  ;;  %v832_v54 = vmul.f32 %v824_v41, %v808_v46 }
 0x1f6   : > { %890 = vst.msk [vmem:[%s2168_s15 + $0x8] sm:$0xff] %vm856_vm1, %v882_v16  ;;  %v881_v21 = vmin.f32 %v873_v17, 1.0  ;;  %v876_v22 = vmax.f32 %v868_v18, 0.0  ;;  %v867_v23 = vadd.f32 %v818_v15, %v2164_v19  ;;  %v826_v56 = vsub.f32 1.0, %v2164_v19 }
 0x1f7   : > { %v2173_v24 = vpop.f32.mrf.mxu1  ;;  %v835_v0 = vmul.f32 %v827_v49, %v811_v55 }
 0x1f8   : > { %889 = vst.msk [vmem:[%s2168_s15] sm:$0xff] %vm856_vm1, %v881_v21  ;;  %v884_v26 = vmin.f32 %v876_v22, 1.0  ;;  %v875_v27 = vmax.f32 %v867_v23, 0.0  ;;  %v870_v28 = vadd.f32 %v2173_v24, %v821_v20  ;;  %v829_v62 = vsub.f32 1.0, %v2173_v24 }
 0x1f9   : > { %v2179_v29 = vpop.f32.mrf.mxu1 }
 0x1fa   : > { %892 = vst.msk [vmem:[%s2168_s15 + $0x18] sm:$0xff] %vm856_vm1, %v884_v26  ;;  %v883_v31 = vmin.f32 %v875_v27, 1.0  ;;  %v878_v32 = vmax.f32 %v870_v28, 0.0  ;;  %v869_v33 = vadd.f32 %v820_v25, %v2179_v29 }
 0x1fb   : > { %v2185_v35 = vpop.f32.mrf.mxu1 }
 0x1fc   : > { %891 = vst.msk [vmem:[%s2168_s15 + $0x10] sm:$0xff] %vm856_vm1, %v883_v31  ;;  %v886_v37 = vmin.f32 %v878_v32, 1.0  ;;  %v877_v38 = vmax.f32 %v869_v33, 0.0  ;;  %v872_v39 = vadd.f32 %v2185_v35, %v823_v30 }
 0x1fd   : > { %v2192_v42 = vpop.f32.mrf.mxu1 }
 0x1fe   : > { %894 = vst.msk [vmem:[%s2168_s15 + $0x28] sm:$0xff] %vm856_vm1, %v886_v37  ;;  %v885_v43 = vmin.f32 %v877_v38, 1.0  ;;  %v880_v44 = vmax.f32 %v872_v39, 0.0  ;;  %v871_v45 = vadd.f32 %v822_v36, %v2192_v42 }
 0x1ff   : > { %v1272_v47 = vpop.f32.mrf.mxu0 }
 0x200   : > { %893 = vst.msk [vmem:[%s2168_s15 + $0x20] sm:$0xff] %vm856_vm1, %v885_v43  ;;  %v888_v50 = vmin.f32 %v880_v44, 1.0  ;;  %v879_v51 = vmax.f32 %v871_v45, 0.0  ;;  %v841_v52 = vmul.f32 %v1316_v7, %v1272_v47 }
 0x201   : > { %v655_v53 = vpop.f32.mrf.mxu0 }
 0x202   : > { %896 = vst.msk [vmem:[%s2168_s15 + $0x38] sm:$0xff] %vm856_vm1, %v888_v50  ;;  %v887_v57 = vmin.f32 %v879_v51, 1.0  ;;  %v849_v58 = vadd.f32 %v841_v52, %v833_v48  ;;  %v840_v59 = vmul.f32 %v769_v10, %v655_v53 }
 0x203   : > { %v1275_v60 = vpop.f32.mrf.mxu0 }
 0x204   : > { %895 = vst.msk [vmem:[%s2168_s15 + $0x30] sm:$0xff] %vm856_vm1, %v887_v57  ;;  %858 = vst.msk [vmem:[%s2221_s18 + $0x8] sm:$0xff] %vm856_vm1, %v849_v58  ;;  %v848_v63 = vadd.f32 %v840_v59, %v832_v54  ;;  %v843_v1 = vmul.f32 %v2160_v14, %v1275_v60 }
 0x205   : > { %v665_v3 = vpop.f32.mrf.mxu0 }
 0x206   : > { %1536 = shalt.err (!%p1533_p5)
}
 0x207   : > { %s1537_s2 = scalar_lea.hbm %s2212_s7, 1024  ;;  %s1541_s11 = scalar_lea.hbm %s2336_s6, 2048 }
 0x208   : > { %p1538_p2 = scmp.ne.s32.totalorder %s2212_s7, %s1537_s2  ;;  %p1542_p12 = scmp.lt.s32.totalorder %s2212_s7, %s2336_s6 }
 0x209   : > { %p1543_p7 = scmp.lt.s32.totalorder %s1541_s11, %s1537_s2 }
 0x20a   : > { %p1539_p9 = pnand %p1538_p2, %p2366_p1 }
 0x20b   : > { %p1544_p13 = por %p1543_p7, %p1542_p12 }
 0x20c   : > { %p1540_p10 = pneg %p1539_p9 }
 0x20e   : > { %p1545_p4 = pnand %p1544_p13, %p1540_p10 }
 0x210   : > { %1548 = shalt.err (!%p1545_p4)
}
 0x211   : > { %s1640_s23 = smov 128   ;;  %v828_v4 = vsub.f32 1.0, %v2179_v29  ;;  %857 = vst.msk [vmem:[%s2221_s18] sm:$0xff] %vm856_vm1, %v848_v63  ;;  %v851_v5 = vadd.f32 %v843_v1, %v835_v0  ;;  %v834_v6 = vmul.f32 %v826_v56, %v810_v61  ;;  %v842_v7 = vmul.f32 %v2164_v19, %v665_v3  ;;  %v1278_v8 = vpop.f32.mrf.mxu0  ;;  %v812_v9 = vld [vmem:[%s1900_s17 + $0x20] sm:$0xff]  ;;  %v815_v15 = vld [vmem:[%s1900_s17 + $0x38] sm:$0xff]  ;;  %v814_v20 = vld [vmem:[%s1900_s17 + $0x30] sm:$0xff]  ;;  %s2282_s27 = scalar_lea.hbm %s2335_s5, %s1188_s14 }
 0x212   : > { %1335 = dma.vmem_to_hbm [thread:$0]  (%p2366_p1), %s2214_s16, 1024, %s2212_s7, %s903_s25, %s1640_s23, %s1640_s23, %s1637_s21   ;;  %v831_v10 = vsub.f32 1.0, %v2185_v35  ;;  %v837_v12 = vmul.f32 %v829_v62, %v813_v2  ;;  %v845_v13 = vmul.f32 %v2173_v24, %v1278_v8  ;;  %v830_v16 = vsub.f32 1.0, %v2192_v42 }
 0x213   : > { %860 = vst.msk [vmem:[%s2221_s18 + $0x18] sm:$0xff] %vm856_vm1, %v851_v5  ;;  %v850_v11 = vadd.f32 %v842_v7, %v834_v6  ;;  %v675_v14 = vpop.f32.mrf.mxu0  ;;  %v836_v18 = vmul.f32 %v828_v4, %v812_v9  ;;  %s916_s15 = sshll.u32 %s2221_s18, 4  ;;  %s898_s8 = scalar_lea.sflag [#allocation8], %s1893_s30  ;;  %s2284_s15 = int_to_ptr.vmem [resolvable:$true] %s916_s15 }
 0x214   : > { %v853_v17 = vadd.f32 %v845_v13, %v837_v12  ;;  %v844_v19 = vmul.f32 %v2179_v29, %v675_v14  ;;  %v839_v23 = vmul.f32 %v831_v10, %v815_v15  ;;  %v838_v26 = vmul.f32 %v830_v16, %v814_v20  ;;  %s1549_s7 = scalar_lea.vmem %s2284_s15, 1024  ;;  %s1641_s25 = smov [#allocation14]  }
 0x215   : > { %859 = vst.msk [vmem:[%s2221_s18 + $0x10] sm:$0xff] %vm856_vm1, %v850_v11  ;;  %v1281_v21 = vpop.f32.mrf.mxu0  ;;  %p1550_p6 = scmp.ne.s32.totalorder %s2284_s15, %s1549_s7  ;;  %s1553_s29 = sshll.u32 %s1641_s25, 4  ;;  %s1554_s29 = int_to_ptr.vmem [resolvable:$false] %s1553_s29 }
 0x216   : > { %862 = vst.msk [vmem:[%s2221_s18 + $0x28] sm:$0xff] %vm856_vm1, %v853_v17  ;;  %v852_v22 = vadd.f32 %v844_v19, %v836_v18  ;;  %v847_v24 = vmul.f32 %v2185_v35, %v1281_v21  ;;  %s1555_s19 = scalar_lea.vmem %s1554_s29, 2048  ;;  %p1556_p11 = scmp.lt.s32.totalorder %s2284_s15, %s1554_s29 }
 0x217   : > { %v685_v25 = vpop.f32.mrf.mxu0  ;;  %p1551_p8 = pnand %p1550_p6, %p2366_p1  ;;  %p1557_p3 = scmp.lt.s32.totalorder %s1555_s19, %s1549_s7 }
 0x218   : > { %861 = vst.msk [vmem:[%s2221_s18 + $0x20] sm:$0xff] %vm856_vm1, %v852_v22  ;;  %v855_v27 = vadd.f32 %v847_v24, %v839_v23  ;;  %v846_v28 = vmul.f32 %v2192_v42, %v685_v25 }
 0x219   : > { %p1552_p0 = pneg %p1551_p8  ;;  %p1558_p5 = por %p1557_p3, %p1556_p11 }
 0x21a   : > { %864 = vst.msk [vmem:[%s2221_s18 + $0x38] sm:$0xff] %vm856_vm1, %v855_v27  ;;  %v854_v29 = vadd.f32 %v846_v28, %v838_v26 }
 0x21b   : > { %p1559_p2 = pnand %p1558_p5, %p1552_p0 }
 0x21c   : > { %863 = vst.msk [vmem:[%s2221_s18 + $0x30] sm:$0xff] %vm856_vm1, %v854_v29 }
 0x21d   : > { %1562 = shalt.err (!%p1559_p2)
}
 0x21e   : > { %s1563_s14 = scalar_lea.hbm %s2282_s27, 1024  ;;  %s1567_s10 = scalar_lea.hbm %s2335_s5, 2048 }
 0x21f   : > { %p1564_p9 = scmp.ne.s32.totalorder %s2282_s27, %s1563_s14  ;;  %p1568_p7 = scmp.lt.s32.totalorder %s2282_s27, %s2335_s5 }
 0x220   : > { %p1569_p13 = scmp.lt.s32.totalorder %s1567_s10, %s1563_s14 }
 0x221   : > { %p1565_p10 = pnand %p1564_p9, %p2366_p1 }
 0x222   : > { %p1570_p4 = por %p1569_p13, %p1568_p7 }
 0x223   : > { %p1566_p12 = pneg %p1565_p10 }
 0x225   : > { %p1571_p6 = pnand %p1570_p4, %p1566_p12 }
 0x227   : > { %1574 = shalt.err (!%p1571_p6)
}
 0x228   : > { %1334 = dma.vmem_to_hbm [thread:$0]  (%p2366_p1), %s2284_s15, 1024, %s2282_s27, %s898_s8, %s1640_s23, %s1640_s23, %s1637_s21  }
 0x229 PF: > { %s2367_s2 = sld [smem:[#allocation24_spill]]  ;;  %s947_s22 = sand.u32 1, %s1615_s0  }
 0x22a   : > { %p2368_p8 = scmp.ne.s32.totalorder %s2355_s13, 0  ;;  %s948_s9 = scalar_lea.sflag [#allocation8], %s947_s22 }
 0x22f   : > { %p2369_p0 = scmp.ge.s32.totalorder %s2367_s2, 2 }
 0x231   : > { %p1352_p11 = pnand %p2369_p0, %p2368_p8 }
 0x233   : > { %p1353_p3 = pneg %p1352_p11 }
 0x235   : > { %1606 = dma.done.wait (%p1353_p3), %s948_s9, 1024  }
 0x236   : > { %1608 = vsyncadd (%p1353_p3), %s948_s9, 4294966272  ;;  %s957_s11 = scalar_lea.sflag [#allocation16], %s947_s22 }
 0x237   : > { %1610 = dma.done.wait (%p1353_p3), %s957_s11, 1024  }
 0x238   : > { %1612 = vsyncadd (%p1353_p3), %s957_s11, 4294966272  ;;  %s2370_s28 = sld [smem:[#allocation25_spill]]  ;;  %s2373_s0 = smov %s1619_s26 }
 0x239   : > { %s2371_s12 = sld [smem:[#allocation23_spill]] }
 0x23a   : > { %s2372_s27 = sld [smem:[#allocation26_spill]] }
 0x23e   : > { %p35_p1 = scmp.ge.s32.totalorder %s2370_s28, 4  }
 0x23f   : > { %s2374_s26 = smov %s2371_s12 }
 0x240   :  { %37 = sbr.rel (!%p35_p1) target bundleno = 27 (0x1b), region = 137 }
 0x245   :  { %962 = vsyncpa [#allocation7], 1 }
 0x246   :  { %964 = vsyncpa [#allocation7 + $0x1], 1 }
 0x247   :  { %965 = vsyncpa [#allocation10], 1 }
 0x248   :  { %967 = vsyncpa [#allocation10 + $0x1], 1 }
 0x249   :  { %968 = vsyncpa [#allocation13], 1 }
 0x24a   :  { %970 = vsyncpa [#allocation13 + $0x1], 1 }
 0x24b   :  { %971 = vsyncpa [#allocation8], 1 }
 0x24c   :  { %973 = vsyncpa [#allocation8 + $0x1], 1 }
 0x24d   :  { %974 = vsyncpa [#allocation16], 1 }
 0x24e   :  { %976 = vsyncpa [#allocation16 + $0x1], 1 }

</bundles_post_ra>
